<compile_context>
chip_gen: v7x
topology: tpu7x:2x2x1
jax: 0.10.0
libtpu: 0.0.40
codegen_flags: <defaults>
</compile_context>

<pallas_src>
import math
from dataclasses import dataclass
from functools import partial

import jax
import jax.numpy as jnp
from jax.experimental import pallas as pl
from jax.experimental.pallas import tpu as pltpu


@dataclass
class AttentionConfig:
    max_len: int
    num_embeddings: int
    n_encoder_layers: int = 8
    n_decoder_layers: int = 8
    d_model: int = 512
    n_heads: int = 8
    ff_dim: int = 1024
    drop_prob: float = 0.1


def _compute_vmem_limit():
    """~48 MiB on v7x (64 MiB/TC), ~96-100 MiB on v5e/v6e (128 MiB)."""
    try:
        cap = int(pltpu.get_tpu_info().vmem_capacity_bytes)
    except Exception:
        cap = 64 * 1024 * 1024
    return int(min(cap - 16 * 1024 * 1024, 100 * 1024 * 1024))


_VMEM_LIMIT = _compute_vmem_limit()
# bigger row tiles where VMEM allows (v5e/v6e); conservative on v7x
_ROW_TILE = 1024 if _VMEM_LIMIT >= 90 * 1024 * 1024 else 512


def _pick_tile(dim, target, align):
    """Largest multiple of `align` that divides `dim` and is <= target; else full dim."""
    if dim <= target:
        return dim
    t = (target // align) * align
    while t >= align:
        if dim % t == 0:
            return t
        t -= align
    return dim


# --------------------------------------------------------------------------
# Pallas kernels
# --------------------------------------------------------------------------
def _linear_kernel(x_ref, w_ref, b_ref, o_ref):
    acc = jnp.dot(x_ref[...], w_ref[...], preferred_element_type=jnp.float32)
    o_ref[...] = (acc + b_ref[...]).astype(o_ref.dtype)


def _linear_add_ln_kernel(x_ref, w_ref, b_ref, r_ref, g_ref, beta_ref, o_ref):
    # fused: (x @ w + b) + residual  ->  LayerNorm (stats in f32)
    acc = jnp.dot(x_ref[...], w_ref[...], preferred_element_type=jnp.float32) + b_ref[...]
    x = acc + r_ref[...].astype(jnp.float32)
    mu = jnp.mean(x, axis=-1, keepdims=True)
    var = jnp.mean((x - mu) ** 2, axis=-1, keepdims=True)
    xn = (x - mu) * jax.lax.rsqrt(var + 1e-5)
    o_ref[...] = (xn * g_ref[...] + beta_ref[...]).astype(o_ref.dtype)


def _ffn_ln_kernel(x_ref, w1_ref, b1_ref, w2_ref, b2_ref, g_ref, beta_ref, o_ref):
    # fused: LayerNorm(x + FFN(x))
    xin = x_ref[...]
    h = jnp.dot(xin, w1_ref[...], preferred_element_type=jnp.float32) + b1_ref[...]
    h = jnp.maximum(h, 0.0).astype(w2_ref.dtype)
    f = jnp.dot(h, w2_ref[...], preferred_element_type=jnp.float32) + b2_ref[...]
    x = f + xin.astype(jnp.float32)
    mu = jnp.mean(x, axis=-1, keepdims=True)
    var = jnp.mean((x - mu) ** 2, axis=-1, keepdims=True)
    xn = (x - mu) * jax.lax.rsqrt(var + 1e-5)
    o_ref[...] = (xn * g_ref[...] + beta_ref[...]).astype(o_ref.dtype)


def _attn_kernel(q_ref, kv_ref, *rest, n_heads, d_model, scale,
                 q_off, k_off, v_off, has_mask):
    # One batch element, a tile of query rows, ALL heads.
    # Head split/merge happens in-register (static lane slices + concat),
    # output is a lane-dense (tq, D) slab.  Scores kept at (tq, Sk) per head.
    if has_mask:
        m_ref, o_ref = rest
        m = m_ref[...]                       # (tq, Sk) additive f32
    else:
        (o_ref,) = rest
        m = None
    H, D = n_heads, d_model
    Dh = D // H
    q_all = q_ref[0]                         # (tq, Wq)  bf16
    kv_all = kv_ref[0]                       # (Sk, Wkv) bf16
    outs = []
    for h in range(H):
        qh = q_all[:, q_off + h * Dh: q_off + (h + 1) * Dh] * scale   # scale folded into q
        kh = kv_all[:, k_off + h * Dh: k_off + (h + 1) * Dh]
        vh = kv_all[:, v_off + h * Dh: v_off + (h + 1) * Dh]
        s = jax.lax.dot_general(qh, kh, (((1,), (1,)), ((), ())),
                                preferred_element_type=jnp.float32)   # (tq, Sk)
        if m is not None:
            s = s + m
        s = s - jnp.max(s, axis=-1, keepdims=True)
        p = jnp.exp(s)
        p = p / jnp.sum(p, axis=-1, keepdims=True)                    # exact division
        oh = jnp.dot(p.astype(vh.dtype), vh,
                     preferred_element_type=jnp.float32)              # (tq, Dh)
        outs.append(oh)
    o_ref[0] = jnp.concatenate(outs, axis=-1).astype(o_ref.dtype)     # (tq, D) wide store


def _linear_logsoftmax_kernel(x_ref, w_ref, b_ref, o_ref):
    # fused vocab projection + log-softmax (whole vocab resident in VMEM)
    logits = jnp.dot(x_ref[...], w_ref[...], preferred_element_type=jnp.float32) + b_ref[...]
    mx = jnp.max(logits, axis=-1, keepdims=True)
    z = logits - mx
    lse = jnp.log(jnp.sum(jnp.exp(z), axis=-1, keepdims=True))
    o_ref[...] = (z - lse).astype(o_ref.dtype)


def _logsoftmax_kernel(x_ref, o_ref):
    x = x_ref[...].astype(jnp.float32)
    mx = jnp.max(x, axis=-1, keepdims=True)
    z = x - mx
    lse = jnp.log(jnp.sum(jnp.exp(z), axis=-1, keepdims=True))
    o_ref[...] = (z - lse).astype(o_ref.dtype)


# --------------------------------------------------------------------------
# Pallas wrappers
# --------------------------------------------------------------------------
def linear(x2d, w, b, out_dtype=None, tm_target=_ROW_TILE, tn_target=512):
    """Matmul + bias.  Small weights stay fully resident (row-tiled grid);
    large weights are N-tiled with the weight tile resident across the inner
    row axis so it is streamed from HBM exactly once."""
    M, K = x2d.shape
    N = w.shape[1]
    out_dtype = out_dtype or x2d.dtype
    tm = _pick_tile(M, tm_target, 16)
    w_bytes = K * N * w.dtype.itemsize
    if w_bytes <= min(8 * 1024 * 1024, _VMEM_LIMIT // 6):
        return pl.pallas_call(
            _linear_kernel,
            out_shape=jax.ShapeDtypeStruct((M, N), out_dtype),
            grid=(M // tm,),
            in_specs=[pl.BlockSpec((tm, K), lambda i: (i, 0)),
                      pl.BlockSpec((K, N), lambda i: (0, 0)),
                      pl.BlockSpec((1, N), lambda i: (0, 0))],
            out_specs=pl.BlockSpec((tm, N), lambda i: (i, 0)),
            compiler_params=pltpu.CompilerParams(
                dimension_semantics=("parallel",),
                vmem_limit_bytes=_VMEM_LIMIT),
        )(x2d, w, b.reshape(1, N))
    # large weight (e.g. vocab projection fallback): N outer, rows inner ->
    # the (K, tn) weight tile is resident across the inner axis.
    tn = _pick_tile(N, tn_target, 128)
    return pl.pallas_call(
        _linear_kernel,
        out_shape=jax.ShapeDtypeStruct((M, N), out_dtype),
        grid=(N // tn, M // tm),
        in_specs=[pl.BlockSpec((tm, K), lambda j, i: (i, 0)),
                  pl.BlockSpec((K, tn), lambda j, i: (0, j)),
                  pl.BlockSpec((1, tn), lambda j, i: (0, j))],
        out_specs=pl.BlockSpec((tm, tn), lambda j, i: (i, j)),
        compiler_params=pltpu.CompilerParams(
            dimension_semantics=("parallel", "parallel"),
            vmem_limit_bytes=_VMEM_LIMIT),
    )(x2d, w, b.reshape(1, N))


def linear_add_layernorm(x2d, w, b, r2d, g, beta, tm_target=_ROW_TILE):
    """Fused: LayerNorm(r + (x @ w + b)).  Used for the MHA output projection."""
    M, K = x2d.shape
    N = w.shape[1]
    tm = _pick_tile(M, tm_target, 16)
    return pl.pallas_call(
        _linear_add_ln_kernel,
        out_shape=jax.ShapeDtypeStruct((M, N), x2d.dtype),
        grid=(M // tm,),
        in_specs=[pl.BlockSpec((tm, K), lambda i: (i, 0)),
                  pl.BlockSpec((K, N), lambda i: (0, 0)),
                  pl.BlockSpec((1, N), lambda i: (0, 0)),
                  pl.BlockSpec((tm, N), lambda i: (i, 0)),
                  pl.BlockSpec((1, N), lambda i: (0, 0)),
                  pl.BlockSpec((1, N), lambda i: (0, 0))],
        out_specs=pl.BlockSpec((tm, N), lambda i: (i, 0)),
        compiler_params=pltpu.CompilerParams(
            dimension_semantics=("parallel",),
            vmem_limit_bytes=_VMEM_LIMIT),
    )(x2d, w, b.reshape(1, N), r2d, g.reshape(1, N), beta.reshape(1, N))


def ffn_ln(x2d, p, g, beta, tm_target=_ROW_TILE):
    """Fused: LayerNorm(x + W2 relu(W1 x + b1) + b2)."""
    M, D = x2d.shape
    F = p["w1"].shape[1]
    tm = _pick_tile(M, tm_target, 16)
    return pl.pallas_call(
        _ffn_ln_kernel,
        out_shape=jax.ShapeDtypeStruct((M, D), x2d.dtype),
        grid=(M // tm,),
        in_specs=[pl.BlockSpec((tm, D), lambda i: (i, 0)),
                  pl.BlockSpec((D, F), lambda i: (0, 0)),
                  pl.BlockSpec((1, F), lambda i: (0, 0)),
                  pl.BlockSpec((F, D), lambda i: (0, 0)),
                  pl.BlockSpec((1, D), lambda i: (0, 0)),
                  pl.BlockSpec((1, D), lambda i: (0, 0)),
                  pl.BlockSpec((1, D), lambda i: (0, 0))],
        out_specs=pl.BlockSpec((tm, D), lambda i: (i, 0)),
        compiler_params=pltpu.CompilerParams(
            dimension_semantics=("parallel",),
            vmem_limit_bytes=_VMEM_LIMIT),
    )(x2d, p["w1"], p["b1"].reshape(1, F), p["w2"], p["b2"].reshape(1, D),
      g.reshape(1, D), beta.reshape(1, D))


def attention(q_src, kv_src, d_model, n_heads, q_off, k_off, v_off, mask=None,
              tq_target=256):
    """All-heads attention with in-kernel head split/merge.

    q_src : (B, Sq, Wq)  query activations; q occupies columns [q_off, q_off+D)
    kv_src: (B, Sk, Wkv) key/value activations; k at [k_off,+D), v at [v_off,+D)
    mask  : optional (Sq, Sk) additive f32 mask (None -> no DMA, no add)
    Output: (B, Sq, D) lane-dense slab with heads already merged.
    """
    # TODO(synk): full flash tiling over Sk (online softmax) for very long
    # sequences; currently only the query axis is tiled.
    B, Sq, Wq = q_src.shape
    Sk, Wkv = kv_src.shape[1], kv_src.shape[2]
    D = d_model
    Dh = D // n_heads
    scale = 1.0 / math.sqrt(Dh)
    tq = _pick_tile(Sq, tq_target, 16)
    grid = (B, Sq // tq)

    in_specs = [pl.BlockSpec((1, tq, Wq), lambda b, i: (b, i, 0)),
                pl.BlockSpec((1, Sk, Wkv), lambda b, i: (b, 0, 0))]
    args = [q_src, kv_src]
    if mask is not None:
        in_specs.append(pl.BlockSpec((tq, Sk), lambda b, i: (i, 0)))
        args.append(mask)

    kernel = partial(_attn_kernel, n_heads=n_heads, d_model=D, scale=scale,
                     q_off=q_off, k_off=k_off, v_off=v_off,
                     has_mask=mask is not None)
    return pl.pallas_call(
        kernel,
        out_shape=jax.ShapeDtypeStruct((B, Sq, D), q_src.dtype),
        grid=grid,
        in_specs=in_specs,
        out_specs=pl.BlockSpec((1, tq, D), lambda b, i: (b, i, 0)),
        compiler_params=pltpu.CompilerParams(
            dimension_semantics=("parallel", "parallel"),
            vmem_limit_bytes=_VMEM_LIMIT),
    )(*args)


def log_softmax(x2d, tm_target=_ROW_TILE):
    M, V = x2d.shape
    row_budget = max(16, (8 * 1024 * 1024) // max(1, V * 4))
    tm = _pick_tile(M, min(tm_target, row_budget), 16)
    return pl.pallas_call(
        _logsoftmax_kernel,
        out_shape=jax.ShapeDtypeStruct((M, V), jnp.float32),
        grid=(M // tm,),
        in_specs=[pl.BlockSpec((tm, V), lambda i: (i, 0))],
        out_specs=pl.BlockSpec((tm, V), lambda i: (i, 0)),
        compiler_params=pltpu.CompilerParams(
            dimension_semantics=("parallel",),
            vmem_limit_bytes=_VMEM_LIMIT),
    )(x2d)


def vocab_logsoftmax(x2d, w, b, tm_target=_ROW_TILE):
    """Final vocab projection fused with log-softmax when the (D, V) weight and
    the (tm, V) f32 logits block fit VMEM; otherwise tiled matmul + LSE kernel."""
    M, K = x2d.shape
    V = w.shape[1]
    tm = _pick_tile(M, tm_target, 16)
    need = (K * V * w.dtype.itemsize            # resident weight
            + 2 * tm * V * 4                    # double-buffered f32 output
            + 2 * tm * K * x2d.dtype.itemsize)  # double-buffered input rows
    if need <= _VMEM_LIMIT // 2:
        return pl.pallas_call(
            _linear_logsoftmax_kernel,
            out_shape=jax.ShapeDtypeStruct((M, V), jnp.float32),
            grid=(M // tm,),
            in_specs=[pl.BlockSpec((tm, K), lambda i: (i, 0)),
                      pl.BlockSpec((K, V), lambda i: (0, 0)),
                      pl.BlockSpec((1, V), lambda i: (0, 0))],
            out_specs=pl.BlockSpec((tm, V), lambda i: (i, 0)),
            compiler_params=pltpu.CompilerParams(
                dimension_semantics=("parallel",),
                vmem_limit_bytes=_VMEM_LIMIT),
        )(x2d, w, b.reshape(1, V))
    # TODO(synk): large-vocab path could fuse via an online LSE over V tiles.
    logits = linear(x2d, w, b, out_dtype=jnp.float32)
    return log_softmax(logits)


# --------------------------------------------------------------------------
# Model (glue in plain JAX, hot paths in Pallas kernels above)
# --------------------------------------------------------------------------
def encoder_layer(x, p, n_heads):
    B, S, D = x.shape
    x2d = x.reshape(B * S, D)
    # fused QKV projection (one (D, 3D) matmul, activation read once)
    qkv = linear(x2d, p["mha"]["wqkv"], p["mha"]["bqkv"]).reshape(B, S, 3 * D)
    a = attention(qkv, qkv, D, n_heads, q_off=0, k_off=D, v_off=2 * D, mask=None)
    # fused output projection + residual + LayerNorm
    x2d = linear_add_layernorm(a.reshape(B * S, D), p["mha"]["wo"], p["mha"]["bo"],
                               x2d, p["ln1_g"], p["ln1_b"])
    # fused FFN + residual + LayerNorm
    x2d = ffn_ln(x2d, p["ffn"], p["ln2_g"], p["ln2_b"])
    return x2d.reshape(B, S, D)


def decoder_layer(y, enc, p, mask1, mask2, n_heads):
    B, S, D = y.shape
    Sk = enc.shape[1]
    y2d = y.reshape(B * S, D)

    # masked self-attention (fused QKV)
    qkv = linear(y2d, p["self_mha"]["wqkv"], p["self_mha"]["bqkv"]).reshape(B, S, 3 * D)
    a = attention(qkv, qkv, D, n_heads, q_off=0, k_off=D, v_off=2 * D, mask=mask1)
    y2d = linear_add_layernorm(a.reshape(B * S, D), p["self_mha"]["wo"],
                               p["self_mha"]["bo"], y2d, p["ln1_g"], p["ln1_b"])

    # cross-attention (Q from decoder, fused KV from encoder output)
    q = linear(y2d, p["cross_mha"]["wq"], p["cross_mha"]["bq"]).reshape(B, S, D)
    kv = linear(enc.reshape(B * Sk, D), p["cross_mha"]["wkv"],
                p["cross_mha"]["bkv"]).reshape(B, Sk, 2 * D)
    c = attention(q, kv, D, n_heads, q_off=0, k_off=0, v_off=D, mask=mask2)
    y2d = linear_add_layernorm(c.reshape(B * S, D), p["cross_mha"]["wo"],
                               p["cross_mha"]["bo"], y2d, p["ln2_g"], p["ln2_b"])

    # fused FFN + residual + LayerNorm
    y2d = ffn_ln(y2d, p["ffn"], p["ln3_g"], p["ln3_b"])
    return y2d.reshape(B, S, D)


def sinusoidal_pe(max_len, d_model):
    pos = jnp.arange(max_len, dtype=jnp.float32)[:, None]
    i = jnp.arange(0, d_model, 2, dtype=jnp.float32)
    angle = pos / jnp.power(10000.0, i / d_model)
    pe = jnp.zeros((max_len, d_model), jnp.float32)
    pe = pe.at[:, 0::2].set(jnp.sin(angle))
    pe = pe.at[:, 1::2].set(jnp.cos(angle))
    return pe


def embed(tokens, table, pe, d_model):
    # TODO(synk): token gather kept in XLA (no clean small-scale Pallas equivalent).
    S = tokens.shape[1]
    return table[tokens] * math.sqrt(d_model) + pe[:S][None, :, :]


def transformer_forward(params, cfg, x_tok, y_tok, out_mask1, out_mask2=None):
    pe = params["pos_enc"]
    x = embed(x_tok, params["emb_in"], pe, cfg.d_model).astype(jnp.bfloat16)
    for p in params["encoders"]:
        x = encoder_layer(x, p, cfg.n_heads)

    y = embed(y_tok, params["emb_out"], pe, cfg.d_model).astype(jnp.bfloat16)
    for p in params["decoders"]:
        y = decoder_layer(y, x, p, out_mask1, out_mask2, cfg.n_heads)

    B, S, D = y.shape
    logp = vocab_logsoftmax(y.reshape(B * S, D), params["out_w"], params["out_b"])
    return logp.reshape(B, S, cfg.num_embeddings)


# --------------------------------------------------------------------------
# Deterministic parameter init (matmul weights bf16, norms/biases f32)
# --------------------------------------------------------------------------
def _dense_init(key, din, dout):
    w = (jax.random.normal(key, (din, dout), jnp.float32) * 0.02).astype(jnp.bfloat16)
    b = jnp.zeros((dout,), jnp.float32)
    return w, b


def _init_self_mha(key, d):
    k1, k2 = jax.random.split(key)
    wqkv, bqkv = _dense_init(k1, d, 3 * d)
    wo, bo = _dense_init(k2, d, d)
    return dict(wqkv=wqkv, bqkv=bqkv, wo=wo, bo=bo)


def _init_cross_mha(key, d):
    kq, kkv, ko = jax.random.split(key, 3)
    wq, bq = _dense_init(kq, d, d)
    wkv, bkv = _dense_init(kkv, d, 2 * d)
    wo, bo = _dense_init(ko, d, d)
    return dict(wq=wq, bq=bq, wkv=wkv, bkv=bkv, wo=wo, bo=bo)


def _init_ffn(key, d, f):
    k1, k2 = jax.random.split(key)
    w1, b1 = _dense_init(k1, d, f)
    w2, b2 = _dense_init(k2, f, d)
    return dict(w1=w1, b1=b1, w2=w2, b2=b2)


def _init_encoder(key, d, f):
    k1, k2 = jax.random.split(key)
    return dict(mha=_init_self_mha(k1, d), ffn=_init_ffn(k2, d, f),
                ln1_g=jnp.ones(d, jnp.float32), ln1_b=jnp.zeros(d, jnp.float32),
                ln2_g=jnp.ones(d, jnp.float32), ln2_b=jnp.zeros(d, jnp.float32))


def _init_decoder(key, d, f):
    k1, k2, k3 = jax.random.split(key, 3)
    return dict(self_mha=_init_self_mha(k1, d), cross_mha=_init_cross_mha(k2, d),
                ffn=_init_ffn(k3, d, f),
                ln1_g=jnp.ones(d, jnp.float32), ln1_b=jnp.zeros(d, jnp.float32),
                ln2_g=jnp.ones(d, jnp.float32), ln2_b=jnp.zeros(d, jnp.float32),
                ln3_g=jnp.ones(d, jnp.float32), ln3_b=jnp.zeros(d, jnp.float32))


def init_params(key, cfg):
    ks = jax.random.split(key, 5)
    wl, bl = _dense_init(ks[4], cfg.d_model, cfg.num_embeddings)
    return dict(
        emb_in=jax.random.normal(ks[0], (cfg.num_embeddings, cfg.d_model), jnp.float32) * 0.02,
        emb_out=jax.random.normal(ks[1], (cfg.num_embeddings, cfg.d_model), jnp.float32) * 0.02,
        pos_enc=sinusoidal_pe(cfg.max_len, cfg.d_model),
        encoders=[_init_encoder(k, cfg.d_model, cfg.ff_dim)
                  for k in jax.random.split(ks[2], cfg.n_encoder_layers)],
        decoders=[_init_decoder(k, cfg.d_model, cfg.ff_dim)
                  for k in jax.random.split(ks[3], cfg.n_decoder_layers)],
        out_w=wl, out_b=bl,
    )


# --------------------------------------------------------------------------
if __name__ == "__main__":
    cfg = AttentionConfig(max_len=16, num_embeddings=50,
                          n_encoder_layers=2, n_decoder_layers=2,
                          d_model=32, n_heads=4, ff_dim=64, drop_prob=0.1)

    B, S = 2, 8
    key = jax.random.PRNGKey(0)
    kp, kx, ky = jax.random.split(key, 3)

    params = init_params(kp, cfg)
    x_tok = jax.random.randint(kx, (B, S), 0, cfg.num_embeddings, dtype=jnp.int32)
    y_tok = jax.random.randint(ky, (B, S), 0, cfg.num_embeddings, dtype=jnp.int32)

    # causal additive mask for decoder self-attention; no cross-attn mask
    causal = jnp.where(jnp.tril(jnp.ones((S, S), jnp.bool_)), 0.0, -1e9).astype(jnp.float32)

    @jax.jit
    def run(p, xt, yt, m1):
        return transformer_forward(p, cfg, xt, yt, m1, None)

    out = run(params, x_tok, y_tok, causal)
    out = jax.block_until_ready(out)
    assert out.shape == (B, S, cfg.num_embeddings)
    assert bool(jnp.all(jnp.isfinite(out)))
    print("KERNEL_OK")
</pallas_src>

<mosaic_0001>
module attributes {stable_mosaic.version = 11 : i64} {
  func.func @_linear_kernel(%arg0: i32, %arg1: memref<16x32xbf16, #tpu.memory_space<vmem>>, %arg2: memref<32x96xbf16, #tpu.memory_space<vmem>>, %arg3: memref<1x96xf32, #tpu.memory_space<vmem>>, %arg4: memref<16x96xbf16, #tpu.memory_space<vmem>>) attributes {dimension_semantics = [#tpu.dimension_semantics<parallel>], iteration_bounds = array<i64: 1>, scalar_prefetch = 0 : i64, scratch_operands = 0 : i64, tpu.core_type = #tpu.core_type<tc>, window_params = [{transform_indices = @transform_0, window_bounds = array<i64: 16, 32>}, {pipeline_mode = #tpu.pipeline_mode<synchronous>, transform_indices = @transform_1, window_bounds = array<i64: 32, 96>}, {pipeline_mode = #tpu.pipeline_mode<synchronous>, transform_indices = @transform_2, window_bounds = array<i64: 1, 96>}, {transform_indices = @transform_3, window_bounds = array<i64: 16, 96>}]} {
    %c0 = arith.constant 0 : index
    %c0_0 = arith.constant 0 : index
    %0 = vector.load %arg1[%c0, %c0_0] : memref<16x32xbf16, #tpu.memory_space<vmem>>, vector<16x32xbf16>
    %c0_1 = arith.constant 0 : index
    %c0_2 = arith.constant 0 : index
    %1 = vector.load %arg2[%c0_1, %c0_2] : memref<32x96xbf16, #tpu.memory_space<vmem>>, vector<32x96xbf16>
    %cst = arith.constant dense<0.000000e+00> : vector<16x96xf32>
    %2 = tpu.matmul %0, %1, %cst {dimension_numbers = #tpu.dot_dimension_numbers<[1], [0], [0], [1], [0, 0, 1, 1], [], []>} : vector<16x32xbf16>, vector<32x96xbf16>, vector<16x96xf32> -> vector<16x96xf32>
    %c0_3 = arith.constant 0 : index
    %c0_4 = arith.constant 0 : index
    %3 = vector.load %arg3[%c0_3, %c0_4] : memref<1x96xf32, #tpu.memory_space<vmem>>, vector<1x96xf32>
    %4 = vector.broadcast %3 : vector<1x96xf32> to vector<16x96xf32>
    %5 = arith.addf %2, %4 : vector<16x96xf32>
    %6 = arith.truncf %5 : vector<16x96xf32> to vector<16x96xbf16>
    %c0_5 = arith.constant 0 : index
    %c0_6 = arith.constant 0 : index
    %7 = vector.load %arg4[%c0_5, %c0_6] : memref<16x96xbf16, #tpu.memory_space<vmem>>, vector<16x96xbf16>
    tpu.vector_store %arg4[%c0_5, %c0_6], %6 {strides = array<i32>} : memref<16x96xbf16, #tpu.memory_space<vmem>>, vector<16x96xbf16>,
    return
  }
  func.func @transform_0(%arg0: i32) -> (i32, i32) {
    %c0_i32 = arith.constant 0 : i32
    %c0_i32_0 = arith.constant 0 : i32
    return %arg0, %c0_i32 : i32, i32
  }
  func.func @transform_1(%arg0: i32) -> (i32, i32) {
    %c0_i32 = arith.constant 0 : i32
    %c0_i32_0 = arith.constant 0 : i32
    %c0_i32_1 = arith.constant 0 : i32
    return %c0_i32, %c0_i32_0 : i32, i32
  }
  func.func @transform_2(%arg0: i32) -> (i32, i32) {
    %c0_i32 = arith.constant 0 : i32
    %c0_i32_0 = arith.constant 0 : i32
    %c0_i32_1 = arith.constant 0 : i32
    return %c0_i32, %c0_i32_0 : i32, i32
  }
  func.func @transform_3(%arg0: i32) -> (i32, i32) {
    %c0_i32 = arith.constant 0 : i32
    %c0_i32_0 = arith.constant 0 : i32
    return %arg0, %c0_i32 : i32, i32
  }
}

module attributes {stable_mosaic.version = 11 : i64} {
  func.func @_attn_kernel(%arg0: i32, %arg1: i32, %arg2: memref<1x8x96xbf16, #tpu.memory_space<vmem>>, %arg3: memref<1x8x96xbf16, #tpu.memory_space<vmem>>, %arg4: memref<1x8x32xbf16, #tpu.memory_space<vmem>>) attributes {dimension_semantics = [#tpu.dimension_semantics<parallel>, #tpu.dimension_semantics<parallel>], iteration_bounds = array<i64: 2, 1>, scalar_prefetch = 0 : i64, scratch_operands = 0 : i64, tpu.core_type = #tpu.core_type<tc>, window_params = [{transform_indices = @transform_0, window_bounds = array<i64: 1, 8, 96>}, {transform_indices = @transform_1, window_bounds = array<i64: 1, 8, 96>}, {transform_indices = @transform_2, window_bounds = array<i64: 1, 8, 32>}]} {
    %c0 = arith.constant 0 : index
    %c0_0 = arith.constant 0 : index
    %c0_1 = arith.constant 0 : index
    %0 = vector.load %arg2[%c0, %c0_0, %c0_1] : memref<1x8x96xbf16, #tpu.memory_space<vmem>>, vector<1x8x96xbf16>
    %1 = vector.shape_cast %0 : vector<1x8x96xbf16> to vector<8x96xbf16>
    %c0_2 = arith.constant 0 : index
    %c0_3 = arith.constant 0 : index
    %c0_4 = arith.constant 0 : index
    %2 = vector.load %arg3[%c0_2, %c0_3, %c0_4] : memref<1x8x96xbf16, #tpu.memory_space<vmem>>, vector<1x8x96xbf16>
    %3 = vector.shape_cast %2 : vector<1x8x96xbf16> to vector<8x96xbf16>
    %4 = vector.extract_strided_slice %1 {offsets = [0, 0], sizes = [8, 8], strides = [1, 1]} : vector<8x96xbf16> to vector<8x8xbf16>
    %cst = arith.constant 3.535160e-01 : bf16
    %5 = vector.broadcast %cst : bf16 to vector<8x8xbf16>
    %6 = arith.mulf %4, %5 : vector<8x8xbf16>
    %7 = vector.extract_strided_slice %3 {offsets = [0, 32], sizes = [8, 8], strides = [1, 1]} : vector<8x96xbf16> to vector<8x8xbf16>
    %8 = vector.extract_strided_slice %3 {offsets = [0, 64], sizes = [8, 8], strides = [1, 1]} : vector<8x96xbf16> to vector<8x8xbf16>
    %cst_5 = arith.constant dense<0.000000e+00> : vector<8x8xf32>
    %9 = tpu.matmul %6, %7, %cst_5 {dimension_numbers = #tpu.dot_dimension_numbers<[1], [1], [0], [0], [0, 0, 1, 0], [], []>} : vector<8x8xbf16>, vector<8x8xbf16>, vector<8x8xf32> -> vector<8x8xf32>
    %cst_6 = arith.constant dense<0xFF800000> : vector<8xf32>
    %10 = vector.multi_reduction <maximumf>, %9, %cst_6 [1] : vector<8x8xf32> to vector<8xf32>
    %11 = vector.shape_cast %10 : vector<8xf32> to vector<8x1xf32>
    %12 = vector.broadcast %11 : vector<8x1xf32> to vector<8x8xf32>
    %13 = arith.subf %9, %12 : vector<8x8xf32>
    %14 = math.exp %13 : vector<8x8xf32>
    %cst_7 = arith.constant dense<0.000000e+00> : vector<8xf32>
    %15 = vector.multi_reduction <add>, %14, %cst_7 [1] : vector<8x8xf32> to vector<8xf32>
    %16 = vector.shape_cast %15 : vector<8xf32> to vector<8x1xf32>
    %17 = vector.broadcast %16 : vector<8x1xf32> to vector<8x8xf32>
    %18 = arith.divf %14, %17 : vector<8x8xf32>
    %19 = arith.truncf %18 : vector<8x8xf32> to vector<8x8xbf16>
    %cst_8 = arith.constant dense<0.000000e+00> : vector<8x8xf32>
    %20 = tpu.matmul %19, %8, %cst_8 {dimension_numbers = #tpu.dot_dimension_numbers<[1], [0], [0], [1], [0, 0, 1, 1], [], []>} : vector<8x8xbf16>, vector<8x8xbf16>, vector<8x8xf32> -> vector<8x8xf32>
    %21 = vector.extract_strided_slice %1 {offsets = [0, 8], sizes = [8, 8], strides = [1, 1]} : vector<8x96xbf16> to vector<8x8xbf16>
    %cst_9 = arith.constant 3.535160e-01 : bf16
    %22 = vector.broadcast %cst_9 : bf16 to vector<8x8xbf16>
    %23 = arith.mulf %21, %22 : vector<8x8xbf16>
    %24 = vector.extract_strided_slice %3 {offsets = [0, 40], sizes = [8, 8], strides = [1, 1]} : vector<8x96xbf16> to vector<8x8xbf16>
    %25 = vector.extract_strided_slice %3 {offsets = [0, 72], sizes = [8, 8], strides = [1, 1]} : vector<8x96xbf16> to vector<8x8xbf16>
    %cst_10 = arith.constant dense<0.000000e+00> : vector<8x8xf32>
    %26 = tpu.matmul %23, %24, %cst_10 {dimension_numbers = #tpu.dot_dimension_numbers<[1], [1], [0], [0], [0, 0, 1, 0], [], []>} : vector<8x8xbf16>, vector<8x8xbf16>, vector<8x8xf32> -> vector<8x8xf32>
    %cst_11 = arith.constant dense<0xFF800000> : vector<8xf32>
    %27 = vector.multi_reduction <maximumf>, %26, %cst_11 [1] : vector<8x8xf32> to vector<8xf32>
    %28 = vector.shape_cast %27 : vector<8xf32> to vector<8x1xf32>
    %29 = vector.broadcast %28 : vector<8x1xf32> to vector<8x8xf32>
    %30 = arith.subf %26, %29 : vector<8x8xf32>
    %31 = math.exp %30 : vector<8x8xf32>
    %cst_12 = arith.constant dense<0.000000e+00> : vector<8xf32>
    %32 = vector.multi_reduction <add>, %31, %cst_12 [1] : vector<8x8xf32> to vector<8xf32>
    %33 = vector.shape_cast %32 : vector<8xf32> to vector<8x1xf32>
    %34 = vector.broadcast %33 : vector<8x1xf32> to vector<8x8xf32>
    %35 = arith.divf %31, %34 : vector<8x8xf32>
    %36 = arith.truncf %35 : vector<8x8xf32> to vector<8x8xbf16>
    %cst_13 = arith.constant dense<0.000000e+00> : vector<8x8xf32>
    %37 = tpu.matmul %36, %25, %cst_13 {dimension_numbers = #tpu.dot_dimension_numbers<[1], [0], [0], [1], [0, 0, 1, 1], [], []>} : vector<8x8xbf16>, vector<8x8xbf16>, vector<8x8xf32> -> vector<8x8xf32>
    %38 = vector.extract_strided_slice %1 {offsets = [0, 16], sizes = [8, 8], strides = [1, 1]} : vector<8x96xbf16> to vector<8x8xbf16>
    %cst_14 = arith.constant 3.535160e-01 : bf16
    %39 = vector.broadcast %cst_14 : bf16 to vector<8x8xbf16>
    %40 = arith.mulf %38, %39 : vector<8x8xbf16>
    %41 = vector.extract_strided_slice %3 {offsets = [0, 48], sizes = [8, 8], strides = [1, 1]} : vector<8x96xbf16> to vector<8x8xbf16>
    %42 = vector.extract_strided_slice %3 {offsets = [0, 80], sizes = [8, 8], strides = [1, 1]} : vector<8x96xbf16> to vector<8x8xbf16>
    %cst_15 = arith.constant dense<0.000000e+00> : vector<8x8xf32>
    %43 = tpu.matmul %40, %41, %cst_15 {dimension_numbers = #tpu.dot_dimension_numbers<[1], [1], [0], [0], [0, 0, 1, 0], [], []>} : vector<8x8xbf16>, vector<8x8xbf16>, vector<8x8xf32> -> vector<8x8xf32>
    %cst_16 = arith.constant dense<0xFF800000> : vector<8xf32>
    %44 = vector.multi_reduction <maximumf>, %43, %cst_16 [1] : vector<8x8xf32> to vector<8xf32>
    %45 = vector.shape_cast %44 : vector<8xf32> to vector<8x1xf32>
    %46 = vector.broadcast %45 : vector<8x1xf32> to vector<8x8xf32>
    %47 = arith.subf %43, %46 : vector<8x8xf32>
    %48 = math.exp %47 : vector<8x8xf32>
    %cst_17 = arith.constant dense<0.000000e+00> : vector<8xf32>
    %49 = vector.multi_reduction <add>, %48, %cst_17 [1] : vector<8x8xf32> to vector<8xf32>
    %50 = vector.shape_cast %49 : vector<8xf32> to vector<8x1xf32>
    %51 = vector.broadcast %50 : vector<8x1xf32> to vector<8x8xf32>
    %52 = arith.divf %48, %51 : vector<8x8xf32>
    %53 = arith.truncf %52 : vector<8x8xf32> to vector<8x8xbf16>
    %cst_18 = arith.constant dense<0.000000e+00> : vector<8x8xf32>
    %54 = tpu.matmul %53, %42, %cst_18 {dimension_numbers = #tpu.dot_dimension_numbers<[1], [0], [0], [1], [0, 0, 1, 1], [], []>} : vector<8x8xbf16>, vector<8x8xbf16>, vector<8x8xf32> -> vector<8x8xf32>
    %55 = vector.extract_strided_slice %1 {offsets = [0, 24], sizes = [8, 8], strides = [1, 1]} : vector<8x96xbf16> to vector<8x8xbf16>
    %cst_19 = arith.constant 3.535160e-01 : bf16
    %56 = vector.broadcast %cst_19 : bf16 to vector<8x8xbf16>
    %57 = arith.mulf %55, %56 : vector<8x8xbf16>
    %58 = vector.extract_strided_slice %3 {offsets = [0, 56], sizes = [8, 8], strides = [1, 1]} : vector<8x96xbf16> to vector<8x8xbf16>
    %59 = vector.extract_strided_slice %3 {offsets = [0, 88], sizes = [8, 8], strides = [1, 1]} : vector<8x96xbf16> to vector<8x8xbf16>
    %cst_20 = arith.constant dense<0.000000e+00> : vector<8x8xf32>
    %60 = tpu.matmul %57, %58, %cst_20 {dimension_numbers = #tpu.dot_dimension_numbers<[1], [1], [0], [0], [0, 0, 1, 0], [], []>} : vector<8x8xbf16>, vector<8x8xbf16>, vector<8x8xf32> -> vector<8x8xf32>
    %cst_21 = arith.constant dense<0xFF800000> : vector<8xf32>
    %61 = vector.multi_reduction <maximumf>, %60, %cst_21 [1] : vector<8x8xf32> to vector<8xf32>
    %62 = vector.shape_cast %61 : vector<8xf32> to vector<8x1xf32>
    %63 = vector.broadcast %62 : vector<8x1xf32> to vector<8x8xf32>
    %64 = arith.subf %60, %63 : vector<8x8xf32>
    %65 = math.exp %64 : vector<8x8xf32>
    %cst_22 = arith.constant dense<0.000000e+00> : vector<8xf32>
    %66 = vector.multi_reduction <add>, %65, %cst_22 [1] : vector<8x8xf32> to vector<8xf32>
    %67 = vector.shape_cast %66 : vector<8xf32> to vector<8x1xf32>
    %68 = vector.broadcast %67 : vector<8x1xf32> to vector<8x8xf32>
    %69 = arith.divf %65, %68 : vector<8x8xf32>
    %70 = arith.truncf %69 : vector<8x8xf32> to vector<8x8xbf16>
    %cst_23 = arith.constant dense<0.000000e+00> : vector<8x8xf32>
    %71 = tpu.matmul %70, %59, %cst_23 {dimension_numbers = #tpu.dot_dimension_numbers<[1], [0], [0], [1], [0, 0, 1, 1], [], []>} : vector<8x8xbf16>, vector<8x8xbf16>, vector<8x8xf32> -> vector<8x8xf32>
    %72 = tpu.concatenate %20, %37, %54, %71 in 1 : vector<8x8xf32>, vector<8x8xf32>, vector<8x8xf32>, vector<8x8xf32> -> vector<8x32xf32>
    %73 = arith.truncf %72 : vector<8x32xf32> to vector<8x32xbf16>
    %c0_24 = arith.constant 0 : index
    %c0_25 = arith.constant 0 : index
    %c0_26 = arith.constant 0 : index
    %74 = vector.load %arg4[%c0_24, %c0_25, %c0_26] : memref<1x8x32xbf16, #tpu.memory_space<vmem>>, vector<1x8x32xbf16>
    %75 = vector.shape_cast %74 : vector<1x8x32xbf16> to vector<8x32xbf16>
    %76 = vector.shape_cast %73 : vector<8x32xbf16> to vector<1x8x32xbf16>
    tpu.vector_store %arg4[%c0_24, %c0_25, %c0_26], %76 {strides = array<i32>} : memref<1x8x32xbf16, #tpu.memory_space<vmem>>, vector<1x8x32xbf16>,
    return
  }
  func.func @transform_0(%arg0: i32, %arg1: i32) -> (i32, i32, i32) {
    %c0_i32 = arith.constant 0 : i32
    %c0_i32_0 = arith.constant 0 : i32
    return %arg0, %arg1, %c0_i32 : i32, i32, i32
  }
  func.func @transform_1(%arg0: i32, %arg1: i32) -> (i32, i32, i32) {
    %c0_i32 = arith.constant 0 : i32
    %c0_i32_0 = arith.constant 0 : i32
    %c0_i32_1 = arith.constant 0 : i32
    return %arg0, %c0_i32, %c0_i32_0 : i32, i32, i32
  }
  func.func @transform_2(%arg0: i32, %arg1: i32) -> (i32, i32, i32) {
    %c0_i32 = arith.constant 0 : i32
    %c0_i32_0 = arith.constant 0 : i32
    return %arg0, %arg1, %c0_i32 : i32, i32, i32
  }
}

module attributes {stable_mosaic.version = 11 : i64} {
  func.func @_linear_add_ln_kernel(%arg0: i32, %arg1: memref<16x32xbf16, #tpu.memory_space<vmem>>, %arg2: memref<32x32xbf16, #tpu.memory_space<vmem>>, %arg3: memref<1x32xf32, #tpu.memory_space<vmem>>, %arg4: memref<16x32xbf16, #tpu.memory_space<vmem>>, %arg5: memref<1x32xf32, #tpu.memory_space<vmem>>, %arg6: memref<1x32xf32, #tpu.memory_space<vmem>>, %arg7: memref<16x32xbf16, #tpu.memory_space<vmem>>) attributes {dimension_semantics = [#tpu.dimension_semantics<parallel>], iteration_bounds = array<i64: 1>, scalar_prefetch = 0 : i64, scratch_operands = 0 : i64, tpu.core_type = #tpu.core_type<tc>, window_params = [{transform_indices = @transform_0, window_bounds = array<i64: 16, 32>}, {pipeline_mode = #tpu.pipeline_mode<synchronous>, transform_indices = @transform_1, window_bounds = array<i64: 32, 32>}, {pipeline_mode = #tpu.pipeline_mode<synchronous>, transform_indices = @transform_2, window_bounds = array<i64: 1, 32>}, {transform_indices = @transform_3, window_bounds = array<i64: 16, 32>}, {pipeline_mode = #tpu.pipeline_mode<synchronous>, transform_indices = @transform_4, window_bounds = array<i64: 1, 32>}, {pipeline_mode = #tpu.pipeline_mode<synchronous>, transform_indices = @transform_5, window_bounds = array<i64: 1, 32>}, {transform_indices = @transform_6, window_bounds = array<i64: 16, 32>}]} {
    %c0 = arith.constant 0 : index
    %c0_0 = arith.constant 0 : index
    %0 = vector.load %arg1[%c0, %c0_0] : memref<16x32xbf16, #tpu.memory_space<vmem>>, vector<16x32xbf16>
    %c0_1 = arith.constant 0 : index
    %c0_2 = arith.constant 0 : index
    %1 = vector.load %arg2[%c0_1, %c0_2] : memref<32x32xbf16, #tpu.memory_space<vmem>>, vector<32x32xbf16>
    %cst = arith.constant dense<0.000000e+00> : vector<16x32xf32>
    %2 = tpu.matmul %0, %1, %cst {dimension_numbers = #tpu.dot_dimension_numbers<[1], [0], [0], [1], [0, 0, 1, 1], [], []>} : vector<16x32xbf16>, vector<32x32xbf16>, vector<16x32xf32> -> vector<16x32xf32>
    %c0_3 = arith.constant 0 : index
    %c0_4 = arith.constant 0 : index
    %3 = vector.load %arg3[%c0_3, %c0_4] : memref<1x32xf32, #tpu.memory_space<vmem>>, vector<1x32xf32>
    %4 = vector.broadcast %3 : vector<1x32xf32> to vector<16x32xf32>
    %5 = arith.addf %2, %4 : vector<16x32xf32>
    %c0_5 = arith.constant 0 : index
    %c0_6 = arith.constant 0 : index
    %6 = vector.load %arg4[%c0_5, %c0_6] : memref<16x32xbf16, #tpu.memory_space<vmem>>, vector<16x32xbf16>
    %7 = arith.extf %6 : vector<16x32xbf16> to vector<16x32xf32>
    %8 = arith.addf %5, %7 : vector<16x32xf32>
    %cst_7 = arith.constant dense<0.000000e+00> : vector<16xf32>
    %9 = vector.multi_reduction <add>, %8, %cst_7 [1] : vector<16x32xf32> to vector<16xf32>
    %10 = vector.shape_cast %9 : vector<16xf32> to vector<16x1xf32>
    %cst_8 = arith.constant 3.200000e+01 : f32
    %11 = vector.broadcast %cst_8 : f32 to vector<16x1xf32>
    %12 = arith.divf %10, %11 : vector<16x1xf32>
    %13 = vector.broadcast %12 : vector<16x1xf32> to vector<16x32xf32>
    %14 = arith.subf %8, %13 : vector<16x32xf32>
    %15 = arith.mulf %14, %14 : vector<16x32xf32>
    %cst_9 = arith.constant dense<0.000000e+00> : vector<16xf32>
    %16 = vector.multi_reduction <add>, %15, %cst_9 [1] : vector<16x32xf32> to vector<16xf32>
    %17 = vector.shape_cast %16 : vector<16xf32> to vector<16x1xf32>
    %cst_10 = arith.constant 3.200000e+01 : f32
    %18 = vector.broadcast %cst_10 : f32 to vector<16x1xf32>
    %19 = arith.divf %17, %18 : vector<16x1xf32>
    %20 = vector.broadcast %12 : vector<16x1xf32> to vector<16x32xf32>
    %21 = arith.subf %8, %20 : vector<16x32xf32>
    %cst_11 = arith.constant 9.99999974E-6 : f32
    %22 = vector.broadcast %cst_11 : f32 to vector<16x1xf32>
    %23 = arith.addf %19, %22 : vector<16x1xf32>
    %24 = math.rsqrt %23 : vector<16x1xf32>
    %25 = vector.broadcast %24 : vector<16x1xf32> to vector<16x32xf32>
    %26 = arith.mulf %21, %25 : vector<16x32xf32>
    %c0_12 = arith.constant 0 : index
    %c0_13 = arith.constant 0 : index
    %27 = vector.load %arg5[%c0_12, %c0_13] : memref<1x32xf32, #tpu.memory_space<vmem>>, vector<1x32xf32>
    %28 = vector.broadcast %27 : vector<1x32xf32> to vector<16x32xf32>
    %29 = arith.mulf %26, %28 : vector<16x32xf32>
    %c0_14 = arith.constant 0 : index
    %c0_15 = arith.constant 0 : index
    %30 = vector.load %arg6[%c0_14, %c0_15] : memref<1x32xf32, #tpu.memory_space<vmem>>, vector<1x32xf32>
    %31 = vector.broadcast %30 : vector<1x32xf32> to vector<16x32xf32>
    %32 = arith.addf %29, %31 : vector<16x32xf32>
    %33 = arith.truncf %32 : vector<16x32xf32> to vector<16x32xbf16>
    %c0_16 = arith.constant 0 : index
    %c0_17 = arith.constant 0 : index
    %34 = vector.load %arg7[%c0_16, %c0_17] : memref<16x32xbf16, #tpu.memory_space<vmem>>, vector<16x32xbf16>
    tpu.vector_store %arg7[%c0_16, %c0_17], %33 {strides = array<i32>} : memref<16x32xbf16, #tpu.memory_space<vmem>>, vector<16x32xbf16>,
    return
  }
  func.func @transform_0(%arg0: i32) -> (i32, i32) {
    %c0_i32 = arith.constant 0 : i32
    %c0_i32_0 = arith.constant 0 : i32
    return %arg0, %c0_i32 : i32, i32
  }
  func.func @transform_1(%arg0: i32) -> (i32, i32) {
    %c0_i32 = arith.constant 0 : i32
    %c0_i32_0 = arith.constant 0 : i32
    %c0_i32_1 = arith.constant 0 : i32
    return %c0_i32, %c0_i32_0 : i32, i32
  }
  func.func @transform_2(%arg0: i32) -> (i32, i32) {
    %c0_i32 = arith.constant 0 : i32
    %c0_i32_0 = arith.constant 0 : i32
    %c0_i32_1 = arith.constant 0 : i32
    return %c0_i32, %c0_i32_0 : i32, i32
  }
  func.func @transform_3(%arg0: i32) -> (i32, i32) {
    %c0_i32 = arith.constant 0 : i32
    %c0_i32_0 = arith.constant 0 : i32
    return %arg0, %c0_i32 : i32, i32
  }
  func.func @transform_4(%arg0: i32) -> (i32, i32) {
    %c0_i32 = arith.constant 0 : i32
    %c0_i32_0 = arith.constant 0 : i32
    %c0_i32_1 = arith.constant 0 : i32
    return %c0_i32, %c0_i32_0 : i32, i32
  }
  func.func @transform_5(%arg0: i32) -> (i32, i32) {
    %c0_i32 = arith.constant 0 : i32
    %c0_i32_0 = arith.constant 0 : i32
    %c0_i32_1 = arith.constant 0 : i32
    return %c0_i32, %c0_i32_0 : i32, i32
  }
  func.func @transform_6(%arg0: i32) -> (i32, i32) {
    %c0_i32 = arith.constant 0 : i32
    %c0_i32_0 = arith.constant 0 : i32
    return %arg0, %c0_i32 : i32, i32
  }
}

module attributes {stable_mosaic.version = 11 : i64} {
  func.func @_ffn_ln_kernel(%arg0: i32, %arg1: memref<16x32xbf16, #tpu.memory_space<vmem>>, %arg2: memref<32x64xbf16, #tpu.memory_space<vmem>>, %arg3: memref<1x64xf32, #tpu.memory_space<vmem>>, %arg4: memref<64x32xbf16, #tpu.memory_space<vmem>>, %arg5: memref<1x32xf32, #tpu.memory_space<vmem>>, %arg6: memref<1x32xf32, #tpu.memory_space<vmem>>, %arg7: memref<1x32xf32, #tpu.memory_space<vmem>>, %arg8: memref<16x32xbf16, #tpu.memory_space<vmem>>) attributes {dimension_semantics = [#tpu.dimension_semantics<parallel>], iteration_bounds = array<i64: 1>, scalar_prefetch = 0 : i64, scratch_operands = 0 : i64, tpu.core_type = #tpu.core_type<tc>, window_params = [{transform_indices = @transform_0, window_bounds = array<i64: 16, 32>}, {pipeline_mode = #tpu.pipeline_mode<synchronous>, transform_indices = @transform_1, window_bounds = array<i64: 32, 64>}, {pipeline_mode = #tpu.pipeline_mode<synchronous>, transform_indices = @transform_2, window_bounds = array<i64: 1, 64>}, {pipeline_mode = #tpu.pipeline_mode<synchronous>, transform_indices = @transform_3, window_bounds = array<i64: 64, 32>}, {pipeline_mode = #tpu.pipeline_mode<synchronous>, transform_indices = @transform_4, window_bounds = array<i64: 1, 32>}, {pipeline_mode = #tpu.pipeline_mode<synchronous>, transform_indices = @transform_5, window_bounds = array<i64: 1, 32>}, {pipeline_mode = #tpu.pipeline_mode<synchronous>, transform_indices = @transform_6, window_bounds = array<i64: 1, 32>}, {transform_indices = @transform_7, window_bounds = array<i64: 16, 32>}]} {
    %c0 = arith.constant 0 : index
    %c0_0 = arith.constant 0 : index
    %0 = vector.load %arg1[%c0, %c0_0] : memref<16x32xbf16, #tpu.memory_space<vmem>>, vector<16x32xbf16>
    %c0_1 = arith.constant 0 : index
    %c0_2 = arith.constant 0 : index
    %1 = vector.load %arg2[%c0_1, %c0_2] : memref<32x64xbf16, #tpu.memory_space<vmem>>, vector<32x64xbf16>
    %cst = arith.constant dense<0.000000e+00> : vector<16x64xf32>
    %2 = tpu.matmul %0, %1, %cst {dimension_numbers = #tpu.dot_dimension_numbers<[1], [0], [0], [1], [0, 0, 1, 1], [], []>} : vector<16x32xbf16>, vector<32x64xbf16>, vector<16x64xf32> -> vector<16x64xf32>
    %c0_3 = arith.constant 0 : index
    %c0_4 = arith.constant 0 : index
    %3 = vector.load %arg3[%c0_3, %c0_4] : memref<1x64xf32, #tpu.memory_space<vmem>>, vector<1x64xf32>
    %4 = vector.broadcast %3 : vector<1x64xf32> to vector<16x64xf32>
    %5 = arith.addf %2, %4 : vector<16x64xf32>
    %cst_5 = arith.constant 0.000000e+00 : f32
    %6 = vector.broadcast %cst_5 : f32 to vector<16x64xf32>
    %7 = arith.maximumf %5, %6 : vector<16x64xf32>
    %8 = arith.truncf %7 : vector<16x64xf32> to vector<16x64xbf16>
    %c0_6 = arith.constant 0 : index
    %c0_7 = arith.constant 0 : index
    %9 = vector.load %arg4[%c0_6, %c0_7] : memref<64x32xbf16, #tpu.memory_space<vmem>>, vector<64x32xbf16>
    %cst_8 = arith.constant dense<0.000000e+00> : vector<16x32xf32>
    %10 = tpu.matmul %8, %9, %cst_8 {dimension_numbers = #tpu.dot_dimension_numbers<[1], [0], [0], [1], [0, 0, 1, 1], [], []>} : vector<16x64xbf16>, vector<64x32xbf16>, vector<16x32xf32> -> vector<16x32xf32>
    %c0_9 = arith.constant 0 : index
    %c0_10 = arith.constant 0 : index
    %11 = vector.load %arg5[%c0_9, %c0_10] : memref<1x32xf32, #tpu.memory_space<vmem>>, vector<1x32xf32>
    %12 = vector.broadcast %11 : vector<1x32xf32> to vector<16x32xf32>
    %13 = arith.addf %10, %12 : vector<16x32xf32>
    %14 = arith.extf %0 : vector<16x32xbf16> to vector<16x32xf32>
    %15 = arith.addf %13, %14 : vector<16x32xf32>
    %cst_11 = arith.constant dense<0.000000e+00> : vector<16xf32>
    %16 = vector.multi_reduction <add>, %15, %cst_11 [1] : vector<16x32xf32> to vector<16xf32>
    %17 = vector.shape_cast %16 : vector<16xf32> to vector<16x1xf32>
    %cst_12 = arith.constant 3.200000e+01 : f32
    %18 = vector.broadcast %cst_12 : f32 to vector<16x1xf32>
    %19 = arith.divf %17, %18 : vector<16x1xf32>
    %20 = vector.broadcast %19 : vector<16x1xf32> to vector<16x32xf32>
    %21 = arith.subf %15, %20 : vector<16x32xf32>
    %22 = arith.mulf %21, %21 : vector<16x32xf32>
    %cst_13 = arith.constant dense<0.000000e+00> : vector<16xf32>
    %23 = vector.multi_reduction <add>, %22, %cst_13 [1] : vector<16x32xf32> to vector<16xf32>
    %24 = vector.shape_cast %23 : vector<16xf32> to vector<16x1xf32>
    %cst_14 = arith.constant 3.200000e+01 : f32
    %25 = vector.broadcast %cst_14 : f32 to vector<16x1xf32>
    %26 = arith.divf %24, %25 : vector<16x1xf32>
    %27 = vector.broadcast %19 : vector<16x1xf32> to vector<16x32xf32>
    %28 = arith.subf %15, %27 : vector<16x32xf32>
    %cst_15 = arith.constant 9.99999974E-6 : f32
    %29 = vector.broadcast %cst_15 : f32 to vector<16x1xf32>
    %30 = arith.addf %26, %29 : vector<16x1xf32>
    %31 = math.rsqrt %30 : vector<16x1xf32>
    %32 = vector.broadcast %31 : vector<16x1xf32> to vector<16x32xf32>
    %33 = arith.mulf %28, %32 : vector<16x32xf32>
    %c0_16 = arith.constant 0 : index
    %c0_17 = arith.constant 0 : index
    %34 = vector.load %arg6[%c0_16, %c0_17] : memref<1x32xf32, #tpu.memory_space<vmem>>, vector<1x32xf32>
    %35 = vector.broadcast %34 : vector<1x32xf32> to vector<16x32xf32>
    %36 = arith.mulf %33, %35 : vector<16x32xf32>
    %c0_18 = arith.constant 0 : index
    %c0_19 = arith.constant 0 : index
    %37 = vector.load %arg7[%c0_18, %c0_19] : memref<1x32xf32, #tpu.memory_space<vmem>>, vector<1x32xf32>
    %38 = vector.broadcast %37 : vector<1x32xf32> to vector<16x32xf32>
    %39 = arith.addf %36, %38 : vector<16x32xf32>
    %40 = arith.truncf %39 : vector<16x32xf32> to vector<16x32xbf16>
    %c0_20 = arith.constant 0 : index
    %c0_21 = arith.constant 0 : index
    %41 = vector.load %arg8[%c0_20, %c0_21] : memref<16x32xbf16, #tpu.memory_space<vmem>>, vector<16x32xbf16>
    tpu.vector_store %arg8[%c0_20, %c0_21], %40 {strides = array<i32>} : memref<16x32xbf16, #tpu.memory_space<vmem>>, vector<16x32xbf16>,
    return
  }
  func.func @transform_0(%arg0: i32) -> (i32, i32) {
    %c0_i32 = arith.constant 0 : i32
    %c0_i32_0 = arith.constant 0 : i32
    return %arg0, %c0_i32 : i32, i32
  }
  func.func @transform_1(%arg0: i32) -> (i32, i32) {
    %c0_i32 = arith.constant 0 : i32
    %c0_i32_0 = arith.constant 0 : i32
    %c0_i32_1 = arith.constant 0 : i32
    return %c0_i32, %c0_i32_0 : i32, i32
  }
  func.func @transform_2(%arg0: i32) -> (i32, i32) {
    %c0_i32 = arith.constant 0 : i32
    %c0_i32_0 = arith.constant 0 : i32
    %c0_i32_1 = arith.constant 0 : i32
    return %c0_i32, %c0_i32_0 : i32, i32
  }
  func.func @transform_3(%arg0: i32) -> (i32, i32) {
    %c0_i32 = arith.constant 0 : i32
    %c0_i32_0 = arith.constant 0 : i32
    %c0_i32_1 = arith.constant 0 : i32
    return %c0_i32, %c0_i32_0 : i32, i32
  }
  func.func @transform_4(%arg0: i32) -> (i32, i32) {
    %c0_i32 = arith.constant 0 : i32
    %c0_i32_0 = arith.constant 0 : i32
    %c0_i32_1 = arith.constant 0 : i32
    return %c0_i32, %c0_i32_0 : i32, i32
  }
  func.func @transform_5(%arg0: i32) -> (i32, i32) {
    %c0_i32 = arith.constant 0 : i32
    %c0_i32_0 = arith.constant 0 : i32
    %c0_i32_1 = arith.constant 0 : i32
    return %c0_i32, %c0_i32_0 : i32, i32
  }
  func.func @transform_6(%arg0: i32) -> (i32, i32) {
    %c0_i32 = arith.constant 0 : i32
    %c0_i32_0 = arith.constant 0 : i32
    %c0_i32_1 = arith.constant 0 : i32
    return %c0_i32, %c0_i32_0 : i32, i32
  }
  func.func @transform_7(%arg0: i32) -> (i32, i32) {
    %c0_i32 = arith.constant 0 : i32
    %c0_i32_0 = arith.constant 0 : i32
    return %arg0, %c0_i32 : i32, i32
  }
}

module attributes {stable_mosaic.version = 11 : i64} {
  func.func @_linear_kernel(%arg0: i32, %arg1: memref<16x32xbf16, #tpu.memory_space<vmem>>, %arg2: memref<32x64xbf16, #tpu.memory_space<vmem>>, %arg3: memref<1x64xf32, #tpu.memory_space<vmem>>, %arg4: memref<16x64xbf16, #tpu.memory_space<vmem>>) attributes {dimension_semantics = [#tpu.dimension_semantics<parallel>], iteration_bounds = array<i64: 1>, scalar_prefetch = 0 : i64, scratch_operands = 0 : i64, tpu.core_type = #tpu.core_type<tc>, window_params = [{transform_indices = @transform_0, window_bounds = array<i64: 16, 32>}, {pipeline_mode = #tpu.pipeline_mode<synchronous>, transform_indices = @transform_1, window_bounds = array<i64: 32, 64>}, {pipeline_mode = #tpu.pipeline_mode<synchronous>, transform_indices = @transform_2, window_bounds = array<i64: 1, 64>}, {transform_indices = @transform_3, window_bounds = array<i64: 16, 64>}]} {
    %c0 = arith.constant 0 : index
    %c0_0 = arith.constant 0 : index
    %0 = vector.load %arg1[%c0, %c0_0] : memref<16x32xbf16, #tpu.memory_space<vmem>>, vector<16x32xbf16>
    %c0_1 = arith.constant 0 : index
    %c0_2 = arith.constant 0 : index
    %1 = vector.load %arg2[%c0_1, %c0_2] : memref<32x64xbf16, #tpu.memory_space<vmem>>, vector<32x64xbf16>
    %cst = arith.constant dense<0.000000e+00> : vector<16x64xf32>
    %2 = tpu.matmul %0, %1, %cst {dimension_numbers = #tpu.dot_dimension_numbers<[1], [0], [0], [1], [0, 0, 1, 1], [], []>} : vector<16x32xbf16>, vector<32x64xbf16>, vector<16x64xf32> -> vector<16x64xf32>
    %c0_3 = arith.constant 0 : index
    %c0_4 = arith.constant 0 : index
    %3 = vector.load %arg3[%c0_3, %c0_4] : memref<1x64xf32, #tpu.memory_space<vmem>>, vector<1x64xf32>
    %4 = vector.broadcast %3 : vector<1x64xf32> to vector<16x64xf32>
    %5 = arith.addf %2, %4 : vector<16x64xf32>
    %6 = arith.truncf %5 : vector<16x64xf32> to vector<16x64xbf16>
    %c0_5 = arith.constant 0 : index
    %c0_6 = arith.constant 0 : index
    %7 = vector.load %arg4[%c0_5, %c0_6] : memref<16x64xbf16, #tpu.memory_space<vmem>>, vector<16x64xbf16>
    tpu.vector_store %arg4[%c0_5, %c0_6], %6 {strides = array<i32>} : memref<16x64xbf16, #tpu.memory_space<vmem>>, vector<16x64xbf16>,
    return
  }
  func.func @transform_0(%arg0: i32) -> (i32, i32) {
    %c0_i32 = arith.constant 0 : i32
    %c0_i32_0 = arith.constant 0 : i32
    return %arg0, %c0_i32 : i32, i32
  }
  func.func @transform_1(%arg0: i32) -> (i32, i32) {
    %c0_i32 = arith.constant 0 : i32
    %c0_i32_0 = arith.constant 0 : i32
    %c0_i32_1 = arith.constant 0 : i32
    return %c0_i32, %c0_i32_0 : i32, i32
  }
  func.func @transform_2(%arg0: i32) -> (i32, i32) {
    %c0_i32 = arith.constant 0 : i32
    %c0_i32_0 = arith.constant 0 : i32
    %c0_i32_1 = arith.constant 0 : i32
    return %c0_i32, %c0_i32_0 : i32, i32
  }
  func.func @transform_3(%arg0: i32) -> (i32, i32) {
    %c0_i32 = arith.constant 0 : i32
    %c0_i32_0 = arith.constant 0 : i32
    return %arg0, %c0_i32 : i32, i32
  }
}

module attributes {stable_mosaic.version = 11 : i64} {
  func.func @_linear_kernel(%arg0: i32, %arg1: memref<16x32xbf16, #tpu.memory_space<vmem>>, %arg2: memref<32x32xbf16, #tpu.memory_space<vmem>>, %arg3: memref<1x32xf32, #tpu.memory_space<vmem>>, %arg4: memref<16x32xbf16, #tpu.memory_space<vmem>>) attributes {dimension_semantics = [#tpu.dimension_semantics<parallel>], iteration_bounds = array<i64: 1>, scalar_prefetch = 0 : i64, scratch_operands = 0 : i64, tpu.core_type = #tpu.core_type<tc>, window_params = [{transform_indices = @transform_0, window_bounds = array<i64: 16, 32>}, {pipeline_mode = #tpu.pipeline_mode<synchronous>, transform_indices = @transform_1, window_bounds = array<i64: 32, 32>}, {pipeline_mode = #tpu.pipeline_mode<synchronous>, transform_indices = @transform_2, window_bounds = array<i64: 1, 32>}, {transform_indices = @transform_3, window_bounds = array<i64: 16, 32>}]} {
    %c0 = arith.constant 0 : index
    %c0_0 = arith.constant 0 : index
    %0 = vector.load %arg1[%c0, %c0_0] : memref<16x32xbf16, #tpu.memory_space<vmem>>, vector<16x32xbf16>
    %c0_1 = arith.constant 0 : index
    %c0_2 = arith.constant 0 : index
    %1 = vector.load %arg2[%c0_1, %c0_2] : memref<32x32xbf16, #tpu.memory_space<vmem>>, vector<32x32xbf16>
    %cst = arith.constant dense<0.000000e+00> : vector<16x32xf32>
    %2 = tpu.matmul %0, %1, %cst {dimension_numbers = #tpu.dot_dimension_numbers<[1], [0], [0], [1], [0, 0, 1, 1], [], []>} : vector<16x32xbf16>, vector<32x32xbf16>, vector<16x32xf32> -> vector<16x32xf32>
    %c0_3 = arith.constant 0 : index
    %c0_4 = arith.constant 0 : index
    %3 = vector.load %arg3[%c0_3, %c0_4] : memref<1x32xf32, #tpu.memory_space<vmem>>, vector<1x32xf32>
    %4 = vector.broadcast %3 : vector<1x32xf32> to vector<16x32xf32>
    %5 = arith.addf %2, %4 : vector<16x32xf32>
    %6 = arith.truncf %5 : vector<16x32xf32> to vector<16x32xbf16>
    %c0_5 = arith.constant 0 : index
    %c0_6 = arith.constant 0 : index
    %7 = vector.load %arg4[%c0_5, %c0_6] : memref<16x32xbf16, #tpu.memory_space<vmem>>, vector<16x32xbf16>
    tpu.vector_store %arg4[%c0_5, %c0_6], %6 {strides = array<i32>} : memref<16x32xbf16, #tpu.memory_space<vmem>>, vector<16x32xbf16>,
    return
  }
  func.func @transform_0(%arg0: i32) -> (i32, i32) {
    %c0_i32 = arith.constant 0 : i32
    %c0_i32_0 = arith.constant 0 : i32
    return %arg0, %c0_i32 : i32, i32
  }
  func.func @transform_1(%arg0: i32) -> (i32, i32) {
    %c0_i32 = arith.constant 0 : i32
    %c0_i32_0 = arith.constant 0 : i32
    %c0_i32_1 = arith.constant 0 : i32
    return %c0_i32, %c0_i32_0 : i32, i32
  }
  func.func @transform_2(%arg0: i32) -> (i32, i32) {
    %c0_i32 = arith.constant 0 : i32
    %c0_i32_0 = arith.constant 0 : i32
    %c0_i32_1 = arith.constant 0 : i32
    return %c0_i32, %c0_i32_0 : i32, i32
  }
  func.func @transform_3(%arg0: i32) -> (i32, i32) {
    %c0_i32 = arith.constant 0 : i32
    %c0_i32_0 = arith.constant 0 : i32
    return %arg0, %c0_i32 : i32, i32
  }
}

module attributes {stable_mosaic.version = 11 : i64} {
  func.func @_attn_kernel(%arg0: i32, %arg1: i32, %arg2: memref<1x8x96xbf16, #tpu.memory_space<vmem>>, %arg3: memref<1x8x96xbf16, #tpu.memory_space<vmem>>, %arg4: memref<8x8xf32, #tpu.memory_space<vmem>>, %arg5: memref<1x8x32xbf16, #tpu.memory_space<vmem>>) attributes {dimension_semantics = [#tpu.dimension_semantics<parallel>, #tpu.dimension_semantics<parallel>], iteration_bounds = array<i64: 2, 1>, scalar_prefetch = 0 : i64, scratch_operands = 0 : i64, tpu.core_type = #tpu.core_type<tc>, window_params = [{transform_indices = @transform_0, window_bounds = array<i64: 1, 8, 96>}, {transform_indices = @transform_1, window_bounds = array<i64: 1, 8, 96>}, {transform_indices = @transform_2, window_bounds = array<i64: 8, 8>}, {transform_indices = @transform_3, window_bounds = array<i64: 1, 8, 32>}]} {
    %c0 = arith.constant 0 : index
    %c0_0 = arith.constant 0 : index
    %0 = vector.load %arg4[%c0, %c0_0] : memref<8x8xf32, #tpu.memory_space<vmem>>, vector<8x8xf32>
    %c0_1 = arith.constant 0 : index
    %c0_2 = arith.constant 0 : index
    %c0_3 = arith.constant 0 : index
    %1 = vector.load %arg2[%c0_1, %c0_2, %c0_3] : memref<1x8x96xbf16, #tpu.memory_space<vmem>>, vector<1x8x96xbf16>
    %2 = vector.shape_cast %1 : vector<1x8x96xbf16> to vector<8x96xbf16>
    %c0_4 = arith.constant 0 : index
    %c0_5 = arith.constant 0 : index
    %c0_6 = arith.constant 0 : index
    %3 = vector.load %arg3[%c0_4, %c0_5, %c0_6] : memref<1x8x96xbf16, #tpu.memory_space<vmem>>, vector<1x8x96xbf16>
    %4 = vector.shape_cast %3 : vector<1x8x96xbf16> to vector<8x96xbf16>
    %5 = vector.extract_strided_slice %2 {offsets = [0, 0], sizes = [8, 8], strides = [1, 1]} : vector<8x96xbf16> to vector<8x8xbf16>
    %cst = arith.constant 3.535160e-01 : bf16
    %6 = vector.broadcast %cst : bf16 to vector<8x8xbf16>
    %7 = arith.mulf %5, %6 : vector<8x8xbf16>
    %8 = vector.extract_strided_slice %4 {offsets = [0, 32], sizes = [8, 8], strides = [1, 1]} : vector<8x96xbf16> to vector<8x8xbf16>
    %9 = vector.extract_strided_slice %4 {offsets = [0, 64], sizes = [8, 8], strides = [1, 1]} : vector<8x96xbf16> to vector<8x8xbf16>
    %cst_7 = arith.constant dense<0.000000e+00> : vector<8x8xf32>
    %10 = tpu.matmul %7, %8, %cst_7 {dimension_numbers = #tpu.dot_dimension_numbers<[1], [1], [0], [0], [0, 0, 1, 0], [], []>} : vector<8x8xbf16>, vector<8x8xbf16>, vector<8x8xf32> -> vector<8x8xf32>
    %11 = arith.addf %10, %0 : vector<8x8xf32>
    %cst_8 = arith.constant dense<0xFF800000> : vector<8xf32>
    %12 = vector.multi_reduction <maximumf>, %11, %cst_8 [1] : vector<8x8xf32> to vector<8xf32>
    %13 = vector.shape_cast %12 : vector<8xf32> to vector<8x1xf32>
    %14 = vector.broadcast %13 : vector<8x1xf32> to vector<8x8xf32>
    %15 = arith.subf %11, %14 : vector<8x8xf32>
    %16 = math.exp %15 : vector<8x8xf32>
    %cst_9 = arith.constant dense<0.000000e+00> : vector<8xf32>
    %17 = vector.multi_reduction <add>, %16, %cst_9 [1] : vector<8x8xf32> to vector<8xf32>
    %18 = vector.shape_cast %17 : vector<8xf32> to vector<8x1xf32>
    %19 = vector.broadcast %18 : vector<8x1xf32> to vector<8x8xf32>
    %20 = arith.divf %16, %19 : vector<8x8xf32>
    %21 = arith.truncf %20 : vector<8x8xf32> to vector<8x8xbf16>
    %cst_10 = arith.constant dense<0.000000e+00> : vector<8x8xf32>
    %22 = tpu.matmul %21, %9, %cst_10 {dimension_numbers = #tpu.dot_dimension_numbers<[1], [0], [0], [1], [0, 0, 1, 1], [], []>} : vector<8x8xbf16>, vector<8x8xbf16>, vector<8x8xf32> -> vector<8x8xf32>
    %23 = vector.extract_strided_slice %2 {offsets = [0, 8], sizes = [8, 8], strides = [1, 1]} : vector<8x96xbf16> to vector<8x8xbf16>
    %cst_11 = arith.constant 3.535160e-01 : bf16
    %24 = vector.broadcast %cst_11 : bf16 to vector<8x8xbf16>
    %25 = arith.mulf %23, %24 : vector<8x8xbf16>
    %26 = vector.extract_strided_slice %4 {offsets = [0, 40], sizes = [8, 8], strides = [1, 1]} : vector<8x96xbf16> to vector<8x8xbf16>
    %27 = vector.extract_strided_slice %4 {offsets = [0, 72], sizes = [8, 8], strides = [1, 1]} : vector<8x96xbf16> to vector<8x8xbf16>
    %cst_12 = arith.constant dense<0.000000e+00> : vector<8x8xf32>
    %28 = tpu.matmul %25, %26, %cst_12 {dimension_numbers = #tpu.dot_dimension_numbers<[1], [1], [0], [0], [0, 0, 1, 0], [], []>} : vector<8x8xbf16>, vector<8x8xbf16>, vector<8x8xf32> -> vector<8x8xf32>
    %29 = arith.addf %28, %0 : vector<8x8xf32>
    %cst_13 = arith.constant dense<0xFF800000> : vector<8xf32>
    %30 = vector.multi_reduction <maximumf>, %29, %cst_13 [1] : vector<8x8xf32> to vector<8xf32>
    %31 = vector.shape_cast %30 : vector<8xf32> to vector<8x1xf32>
    %32 = vector.broadcast %31 : vector<8x1xf32> to vector<8x8xf32>
    %33 = arith.subf %29, %32 : vector<8x8xf32>
    %34 = math.exp %33 : vector<8x8xf32>
    %cst_14 = arith.constant dense<0.000000e+00> : vector<8xf32>
    %35 = vector.multi_reduction <add>, %34, %cst_14 [1] : vector<8x8xf32> to vector<8xf32>
    %36 = vector.shape_cast %35 : vector<8xf32> to vector<8x1xf32>
    %37 = vector.broadcast %36 : vector<8x1xf32> to vector<8x8xf32>
    %38 = arith.divf %34, %37 : vector<8x8xf32>
    %39 = arith.truncf %38 : vector<8x8xf32> to vector<8x8xbf16>
    %cst_15 = arith.constant dense<0.000000e+00> : vector<8x8xf32>
    %40 = tpu.matmul %39, %27, %cst_15 {dimension_numbers = #tpu.dot_dimension_numbers<[1], [0], [0], [1], [0, 0, 1, 1], [], []>} : vector<8x8xbf16>, vector<8x8xbf16>, vector<8x8xf32> -> vector<8x8xf32>
    %41 = vector.extract_strided_slice %2 {offsets = [0, 16], sizes = [8, 8], strides = [1, 1]} : vector<8x96xbf16> to vector<8x8xbf16>
    %cst_16 = arith.constant 3.535160e-01 : bf16
    %42 = vector.broadcast %cst_16 : bf16 to vector<8x8xbf16>
    %43 = arith.mulf %41, %42 : vector<8x8xbf16>
    %44 = vector.extract_strided_slice %4 {offsets = [0, 48], sizes = [8, 8], strides = [1, 1]} : vector<8x96xbf16> to vector<8x8xbf16>
    %45 = vector.extract_strided_slice %4 {offsets = [0, 80], sizes = [8, 8], strides = [1, 1]} : vector<8x96xbf16> to vector<8x8xbf16>
    %cst_17 = arith.constant dense<0.000000e+00> : vector<8x8xf32>
    %46 = tpu.matmul %43, %44, %cst_17 {dimension_numbers = #tpu.dot_dimension_numbers<[1], [1], [0], [0], [0, 0, 1, 0], [], []>} : vector<8x8xbf16>, vector<8x8xbf16>, vector<8x8xf32> -> vector<8x8xf32>
    %47 = arith.addf %46, %0 : vector<8x8xf32>
    %cst_18 = arith.constant dense<0xFF800000> : vector<8xf32>
    %48 = vector.multi_reduction <maximumf>, %47, %cst_18 [1] : vector<8x8xf32> to vector<8xf32>
    %49 = vector.shape_cast %48 : vector<8xf32> to vector<8x1xf32>
    %50 = vector.broadcast %49 : vector<8x1xf32> to vector<8x8xf32>
    %51 = arith.subf %47, %50 : vector<8x8xf32>
    %52 = math.exp %51 : vector<8x8xf32>
    %cst_19 = arith.constant dense<0.000000e+00> : vector<8xf32>
    %53 = vector.multi_reduction <add>, %52, %cst_19 [1] : vector<8x8xf32> to vector<8xf32>
    %54 = vector.shape_cast %53 : vector<8xf32> to vector<8x1xf32>
    %55 = vector.broadcast %54 : vector<8x1xf32> to vector<8x8xf32>
    %56 = arith.divf %52, %55 : vector<8x8xf32>
    %57 = arith.truncf %56 : vector<8x8xf32> to vector<8x8xbf16>
    %cst_20 = arith.constant dense<0.000000e+00> : vector<8x8xf32>
    %58 = tpu.matmul %57, %45, %cst_20 {dimension_numbers = #tpu.dot_dimension_numbers<[1], [0], [0], [1], [0, 0, 1, 1], [], []>} : vector<8x8xbf16>, vector<8x8xbf16>, vector<8x8xf32> -> vector<8x8xf32>
    %59 = vector.extract_strided_slice %2 {offsets = [0, 24], sizes = [8, 8], strides = [1, 1]} : vector<8x96xbf16> to vector<8x8xbf16>
    %cst_21 = arith.constant 3.535160e-01 : bf16
    %60 = vector.broadcast %cst_21 : bf16 to vector<8x8xbf16>
    %61 = arith.mulf %59, %60 : vector<8x8xbf16>
    %62 = vector.extract_strided_slice %4 {offsets = [0, 56], sizes = [8, 8], strides = [1, 1]} : vector<8x96xbf16> to vector<8x8xbf16>
    %63 = vector.extract_strided_slice %4 {offsets = [0, 88], sizes = [8, 8], strides = [1, 1]} : vector<8x96xbf16> to vector<8x8xbf16>
    %cst_22 = arith.constant dense<0.000000e+00> : vector<8x8xf32>
    %64 = tpu.matmul %61, %62, %cst_22 {dimension_numbers = #tpu.dot_dimension_numbers<[1], [1], [0], [0], [0, 0, 1, 0], [], []>} : vector<8x8xbf16>, vector<8x8xbf16>, vector<8x8xf32> -> vector<8x8xf32>
    %65 = arith.addf %64, %0 : vector<8x8xf32>
    %cst_23 = arith.constant dense<0xFF800000> : vector<8xf32>
    %66 = vector.multi_reduction <maximumf>, %65, %cst_23 [1] : vector<8x8xf32> to vector<8xf32>
    %67 = vector.shape_cast %66 : vector<8xf32> to vector<8x1xf32>
    %68 = vector.broadcast %67 : vector<8x1xf32> to vector<8x8xf32>
    %69 = arith.subf %65, %68 : vector<8x8xf32>
    %70 = math.exp %69 : vector<8x8xf32>
    %cst_24 = arith.constant dense<0.000000e+00> : vector<8xf32>
    %71 = vector.multi_reduction <add>, %70, %cst_24 [1] : vector<8x8xf32> to vector<8xf32>
    %72 = vector.shape_cast %71 : vector<8xf32> to vector<8x1xf32>
    %73 = vector.broadcast %72 : vector<8x1xf32> to vector<8x8xf32>
    %74 = arith.divf %70, %73 : vector<8x8xf32>
    %75 = arith.truncf %74 : vector<8x8xf32> to vector<8x8xbf16>
    %cst_25 = arith.constant dense<0.000000e+00> : vector<8x8xf32>
    %76 = tpu.matmul %75, %63, %cst_25 {dimension_numbers = #tpu.dot_dimension_numbers<[1], [0], [0], [1], [0, 0, 1, 1], [], []>} : vector<8x8xbf16>, vector<8x8xbf16>, vector<8x8xf32> -> vector<8x8xf32>
    %77 = tpu.concatenate %22, %40, %58, %76 in 1 : vector<8x8xf32>, vector<8x8xf32>, vector<8x8xf32>, vector<8x8xf32> -> vector<8x32xf32>
    %78 = arith.truncf %77 : vector<8x32xf32> to vector<8x32xbf16>
    %c0_26 = arith.constant 0 : index
    %c0_27 = arith.constant 0 : index
    %c0_28 = arith.constant 0 : index
    %79 = vector.load %arg5[%c0_26, %c0_27, %c0_28] : memref<1x8x32xbf16, #tpu.memory_space<vmem>>, vector<1x8x32xbf16>
    %80 = vector.shape_cast %79 : vector<1x8x32xbf16> to vector<8x32xbf16>
    %81 = vector.shape_cast %78 : vector<8x32xbf16> to vector<1x8x32xbf16>
    tpu.vector_store %arg5[%c0_26, %c0_27, %c0_28], %81 {strides = array<i32>} : memref<1x8x32xbf16, #tpu.memory_space<vmem>>, vector<1x8x32xbf16>,
    return
  }
  func.func @transform_0(%arg0: i32, %arg1: i32) -> (i32, i32, i32) {
    %c0_i32 = arith.constant 0 : i32
    %c0_i32_0 = arith.constant 0 : i32
    return %arg0, %arg1, %c0_i32 : i32, i32, i32
  }
  func.func @transform_1(%arg0: i32, %arg1: i32) -> (i32, i32, i32) {
    %c0_i32 = arith.constant 0 : i32
    %c0_i32_0 = arith.constant 0 : i32
    %c0_i32_1 = arith.constant 0 : i32
    return %arg0, %c0_i32, %c0_i32_0 : i32, i32, i32
  }
  func.func @transform_2(%arg0: i32, %arg1: i32) -> (i32, i32) {
    %c0_i32 = arith.constant 0 : i32
    %c0_i32_0 = arith.constant 0 : i32
    return %arg1, %c0_i32 : i32, i32
  }
  func.func @transform_3(%arg0: i32, %arg1: i32) -> (i32, i32, i32) {
    %c0_i32 = arith.constant 0 : i32
    %c0_i32_0 = arith.constant 0 : i32
    return %arg0, %arg1, %c0_i32 : i32, i32, i32
  }
}

module attributes {stable_mosaic.version = 11 : i64} {
  func.func @_attn_kernel(%arg0: i32, %arg1: i32, %arg2: memref<1x8x32xbf16, #tpu.memory_space<vmem>>, %arg3: memref<1x8x64xbf16, #tpu.memory_space<vmem>>, %arg4: memref<1x8x32xbf16, #tpu.memory_space<vmem>>) attributes {dimension_semantics = [#tpu.dimension_semantics<parallel>, #tpu.dimension_semantics<parallel>], iteration_bounds = array<i64: 2, 1>, scalar_prefetch = 0 : i64, scratch_operands = 0 : i64, tpu.core_type = #tpu.core_type<tc>, window_params = [{transform_indices = @transform_0, window_bounds = array<i64: 1, 8, 32>}, {transform_indices = @transform_1, window_bounds = array<i64: 1, 8, 64>}, {transform_indices = @transform_2, window_bounds = array<i64: 1, 8, 32>}]} {
    %c0 = arith.constant 0 : index
    %c0_0 = arith.constant 0 : index
    %c0_1 = arith.constant 0 : index
    %0 = vector.load %arg2[%c0, %c0_0, %c0_1] : memref<1x8x32xbf16, #tpu.memory_space<vmem>>, vector<1x8x32xbf16>
    %1 = vector.shape_cast %0 : vector<1x8x32xbf16> to vector<8x32xbf16>
    %c0_2 = arith.constant 0 : index
    %c0_3 = arith.constant 0 : index
    %c0_4 = arith.constant 0 : index
    %2 = vector.load %arg3[%c0_2, %c0_3, %c0_4] : memref<1x8x64xbf16, #tpu.memory_space<vmem>>, vector<1x8x64xbf16>
    %3 = vector.shape_cast %2 : vector<1x8x64xbf16> to vector<8x64xbf16>
    %4 = vector.extract_strided_slice %1 {offsets = [0, 0], sizes = [8, 8], strides = [1, 1]} : vector<8x32xbf16> to vector<8x8xbf16>
    %cst = arith.constant 3.535160e-01 : bf16
    %5 = vector.broadcast %cst : bf16 to vector<8x8xbf16>
    %6 = arith.mulf %4, %5 : vector<8x8xbf16>
    %7 = vector.extract_strided_slice %3 {offsets = [0, 0], sizes = [8, 8], strides = [1, 1]} : vector<8x64xbf16> to vector<8x8xbf16>
    %8 = vector.extract_strided_slice %3 {offsets = [0, 32], sizes = [8, 8], strides = [1, 1]} : vector<8x64xbf16> to vector<8x8xbf16>
    %cst_5 = arith.constant dense<0.000000e+00> : vector<8x8xf32>
    %9 = tpu.matmul %6, %7, %cst_5 {dimension_numbers = #tpu.dot_dimension_numbers<[1], [1], [0], [0], [0, 0, 1, 0], [], []>} : vector<8x8xbf16>, vector<8x8xbf16>, vector<8x8xf32> -> vector<8x8xf32>
    %cst_6 = arith.constant dense<0xFF800000> : vector<8xf32>
    %10 = vector.multi_reduction <maximumf>, %9, %cst_6 [1] : vector<8x8xf32> to vector<8xf32>
    %11 = vector.shape_cast %10 : vector<8xf32> to vector<8x1xf32>
    %12 = vector.broadcast %11 : vector<8x1xf32> to vector<8x8xf32>
    %13 = arith.subf %9, %12 : vector<8x8xf32>
    %14 = math.exp %13 : vector<8x8xf32>
    %cst_7 = arith.constant dense<0.000000e+00> : vector<8xf32>
    %15 = vector.multi_reduction <add>, %14, %cst_7 [1] : vector<8x8xf32> to vector<8xf32>
    %16 = vector.shape_cast %15 : vector<8xf32> to vector<8x1xf32>
    %17 = vector.broadcast %16 : vector<8x1xf32> to vector<8x8xf32>
    %18 = arith.divf %14, %17 : vector<8x8xf32>
    %19 = arith.truncf %18 : vector<8x8xf32> to vector<8x8xbf16>
    %cst_8 = arith.constant dense<0.000000e+00> : vector<8x8xf32>
    %20 = tpu.matmul %19, %8, %cst_8 {dimension_numbers = #tpu.dot_dimension_numbers<[1], [0], [0], [1], [0, 0, 1, 1], [], []>} : vector<8x8xbf16>, vector<8x8xbf16>, vector<8x8xf32> -> vector<8x8xf32>
    %21 = vector.extract_strided_slice %1 {offsets = [0, 8], sizes = [8, 8], strides = [1, 1]} : vector<8x32xbf16> to vector<8x8xbf16>
    %cst_9 = arith.constant 3.535160e-01 : bf16
    %22 = vector.broadcast %cst_9 : bf16 to vector<8x8xbf16>
    %23 = arith.mulf %21, %22 : vector<8x8xbf16>
    %24 = vector.extract_strided_slice %3 {offsets = [0, 8], sizes = [8, 8], strides = [1, 1]} : vector<8x64xbf16> to vector<8x8xbf16>
    %25 = vector.extract_strided_slice %3 {offsets = [0, 40], sizes = [8, 8], strides = [1, 1]} : vector<8x64xbf16> to vector<8x8xbf16>
    %cst_10 = arith.constant dense<0.000000e+00> : vector<8x8xf32>
    %26 = tpu.matmul %23, %24, %cst_10 {dimension_numbers = #tpu.dot_dimension_numbers<[1], [1], [0], [0], [0, 0, 1, 0], [], []>} : vector<8x8xbf16>, vector<8x8xbf16>, vector<8x8xf32> -> vector<8x8xf32>
    %cst_11 = arith.constant dense<0xFF800000> : vector<8xf32>
    %27 = vector.multi_reduction <maximumf>, %26, %cst_11 [1] : vector<8x8xf32> to vector<8xf32>
    %28 = vector.shape_cast %27 : vector<8xf32> to vector<8x1xf32>
    %29 = vector.broadcast %28 : vector<8x1xf32> to vector<8x8xf32>
    %30 = arith.subf %26, %29 : vector<8x8xf32>
    %31 = math.exp %30 : vector<8x8xf32>
    %cst_12 = arith.constant dense<0.000000e+00> : vector<8xf32>
    %32 = vector.multi_reduction <add>, %31, %cst_12 [1] : vector<8x8xf32> to vector<8xf32>
    %33 = vector.shape_cast %32 : vector<8xf32> to vector<8x1xf32>
    %34 = vector.broadcast %33 : vector<8x1xf32> to vector<8x8xf32>
    %35 = arith.divf %31, %34 : vector<8x8xf32>
    %36 = arith.truncf %35 : vector<8x8xf32> to vector<8x8xbf16>
    %cst_13 = arith.constant dense<0.000000e+00> : vector<8x8xf32>
    %37 = tpu.matmul %36, %25, %cst_13 {dimension_numbers = #tpu.dot_dimension_numbers<[1], [0], [0], [1], [0, 0, 1, 1], [], []>} : vector<8x8xbf16>, vector<8x8xbf16>, vector<8x8xf32> -> vector<8x8xf32>
    %38 = vector.extract_strided_slice %1 {offsets = [0, 16], sizes = [8, 8], strides = [1, 1]} : vector<8x32xbf16> to vector<8x8xbf16>
    %cst_14 = arith.constant 3.535160e-01 : bf16
    %39 = vector.broadcast %cst_14 : bf16 to vector<8x8xbf16>
    %40 = arith.mulf %38, %39 : vector<8x8xbf16>
    %41 = vector.extract_strided_slice %3 {offsets = [0, 16], sizes = [8, 8], strides = [1, 1]} : vector<8x64xbf16> to vector<8x8xbf16>
    %42 = vector.extract_strided_slice %3 {offsets = [0, 48], sizes = [8, 8], strides = [1, 1]} : vector<8x64xbf16> to vector<8x8xbf16>
    %cst_15 = arith.constant dense<0.000000e+00> : vector<8x8xf32>
    %43 = tpu.matmul %40, %41, %cst_15 {dimension_numbers = #tpu.dot_dimension_numbers<[1], [1], [0], [0], [0, 0, 1, 0], [], []>} : vector<8x8xbf16>, vector<8x8xbf16>, vector<8x8xf32> -> vector<8x8xf32>
    %cst_16 = arith.constant dense<0xFF800000> : vector<8xf32>
    %44 = vector.multi_reduction <maximumf>, %43, %cst_16 [1] : vector<8x8xf32> to vector<8xf32>
    %45 = vector.shape_cast %44 : vector<8xf32> to vector<8x1xf32>
    %46 = vector.broadcast %45 : vector<8x1xf32> to vector<8x8xf32>
    %47 = arith.subf %43, %46 : vector<8x8xf32>
    %48 = math.exp %47 : vector<8x8xf32>
    %cst_17 = arith.constant dense<0.000000e+00> : vector<8xf32>
    %49 = vector.multi_reduction <add>, %48, %cst_17 [1] : vector<8x8xf32> to vector<8xf32>
    %50 = vector.shape_cast %49 : vector<8xf32> to vector<8x1xf32>
    %51 = vector.broadcast %50 : vector<8x1xf32> to vector<8x8xf32>
    %52 = arith.divf %48, %51 : vector<8x8xf32>
    %53 = arith.truncf %52 : vector<8x8xf32> to vector<8x8xbf16>
    %cst_18 = arith.constant dense<0.000000e+00> : vector<8x8xf32>
    %54 = tpu.matmul %53, %42, %cst_18 {dimension_numbers = #tpu.dot_dimension_numbers<[1], [0], [0], [1], [0, 0, 1, 1], [], []>} : vector<8x8xbf16>, vector<8x8xbf16>, vector<8x8xf32> -> vector<8x8xf32>
    %55 = vector.extract_strided_slice %1 {offsets = [0, 24], sizes = [8, 8], strides = [1, 1]} : vector<8x32xbf16> to vector<8x8xbf16>
    %cst_19 = arith.constant 3.535160e-01 : bf16
    %56 = vector.broadcast %cst_19 : bf16 to vector<8x8xbf16>
    %57 = arith.mulf %55, %56 : vector<8x8xbf16>
    %58 = vector.extract_strided_slice %3 {offsets = [0, 24], sizes = [8, 8], strides = [1, 1]} : vector<8x64xbf16> to vector<8x8xbf16>
    %59 = vector.extract_strided_slice %3 {offsets = [0, 56], sizes = [8, 8], strides = [1, 1]} : vector<8x64xbf16> to vector<8x8xbf16>
    %cst_20 = arith.constant dense<0.000000e+00> : vector<8x8xf32>
    %60 = tpu.matmul %57, %58, %cst_20 {dimension_numbers = #tpu.dot_dimension_numbers<[1], [1], [0], [0], [0, 0, 1, 0], [], []>} : vector<8x8xbf16>, vector<8x8xbf16>, vector<8x8xf32> -> vector<8x8xf32>
    %cst_21 = arith.constant dense<0xFF800000> : vector<8xf32>
    %61 = vector.multi_reduction <maximumf>, %60, %cst_21 [1] : vector<8x8xf32> to vector<8xf32>
    %62 = vector.shape_cast %61 : vector<8xf32> to vector<8x1xf32>
    %63 = vector.broadcast %62 : vector<8x1xf32> to vector<8x8xf32>
    %64 = arith.subf %60, %63 : vector<8x8xf32>
    %65 = math.exp %64 : vector<8x8xf32>
    %cst_22 = arith.constant dense<0.000000e+00> : vector<8xf32>
    %66 = vector.multi_reduction <add>, %65, %cst_22 [1] : vector<8x8xf32> to vector<8xf32>
    %67 = vector.shape_cast %66 : vector<8xf32> to vector<8x1xf32>
    %68 = vector.broadcast %67 : vector<8x1xf32> to vector<8x8xf32>
    %69 = arith.divf %65, %68 : vector<8x8xf32>
    %70 = arith.truncf %69 : vector<8x8xf32> to vector<8x8xbf16>
    %cst_23 = arith.constant dense<0.000000e+00> : vector<8x8xf32>
    %71 = tpu.matmul %70, %59, %cst_23 {dimension_numbers = #tpu.dot_dimension_numbers<[1], [0], [0], [1], [0, 0, 1, 1], [], []>} : vector<8x8xbf16>, vector<8x8xbf16>, vector<8x8xf32> -> vector<8x8xf32>
    %72 = tpu.concatenate %20, %37, %54, %71 in 1 : vector<8x8xf32>, vector<8x8xf32>, vector<8x8xf32>, vector<8x8xf32> -> vector<8x32xf32>
    %73 = arith.truncf %72 : vector<8x32xf32> to vector<8x32xbf16>
    %c0_24 = arith.constant 0 : index
    %c0_25 = arith.constant 0 : index
    %c0_26 = arith.constant 0 : index
    %74 = vector.load %arg4[%c0_24, %c0_25, %c0_26] : memref<1x8x32xbf16, #tpu.memory_space<vmem>>, vector<1x8x32xbf16>
    %75 = vector.shape_cast %74 : vector<1x8x32xbf16> to vector<8x32xbf16>
    %76 = vector.shape_cast %73 : vector<8x32xbf16> to vector<1x8x32xbf16>
    tpu.vector_store %arg4[%c0_24, %c0_25, %c0_26], %76 {strides = array<i32>} : memref<1x8x32xbf16, #tpu.memory_space<vmem>>, vector<1x8x32xbf16>,
    return
  }
  func.func @transform_0(%arg0: i32, %arg1: i32) -> (i32, i32, i32) {
    %c0_i32 = arith.constant 0 : i32
    %c0_i32_0 = arith.constant 0 : i32
    return %arg0, %arg1, %c0_i32 : i32, i32, i32
  }
  func.func @transform_1(%arg0: i32, %arg1: i32) -> (i32, i32, i32) {
    %c0_i32 = arith.constant 0 : i32
    %c0_i32_0 = arith.constant 0 : i32
    %c0_i32_1 = arith.constant 0 : i32
    return %arg0, %c0_i32, %c0_i32_0 : i32, i32, i32
  }
  func.func @transform_2(%arg0: i32, %arg1: i32) -> (i32, i32, i32) {
    %c0_i32 = arith.constant 0 : i32
    %c0_i32_0 = arith.constant 0 : i32
    return %arg0, %arg1, %c0_i32 : i32, i32, i32
  }
}

module attributes {stable_mosaic.version = 11 : i64} {
  func.func @_linear_logsoftmax_kernel(%arg0: i32, %arg1: memref<16x32xbf16, #tpu.memory_space<vmem>>, %arg2: memref<32x50xbf16, #tpu.memory_space<vmem>>, %arg3: memref<1x50xf32, #tpu.memory_space<vmem>>, %arg4: memref<16x50xf32, #tpu.memory_space<vmem>>) attributes {dimension_semantics = [#tpu.dimension_semantics<parallel>], iteration_bounds = array<i64: 1>, scalar_prefetch = 0 : i64, scratch_operands = 0 : i64, tpu.core_type = #tpu.core_type<tc>, window_params = [{transform_indices = @transform_0, window_bounds = array<i64: 16, 32>}, {pipeline_mode = #tpu.pipeline_mode<synchronous>, transform_indices = @transform_1, window_bounds = array<i64: 32, 50>}, {pipeline_mode = #tpu.pipeline_mode<synchronous>, transform_indices = @transform_2, window_bounds = array<i64: 1, 50>}, {transform_indices = @transform_3, window_bounds = array<i64: 16, 50>}]} {
    %c0 = arith.constant 0 : index
    %c0_0 = arith.constant 0 : index
    %0 = vector.load %arg1[%c0, %c0_0] : memref<16x32xbf16, #tpu.memory_space<vmem>>, vector<16x32xbf16>
    %c0_1 = arith.constant 0 : index
    %c0_2 = arith.constant 0 : index
    %1 = vector.load %arg2[%c0_1, %c0_2] : memref<32x50xbf16, #tpu.memory_space<vmem>>, vector<32x50xbf16>
    %cst = arith.constant dense<0.000000e+00> : vector<16x50xf32>
    %2 = tpu.matmul %0, %1, %cst {dimension_numbers = #tpu.dot_dimension_numbers<[1], [0], [0], [1], [0, 0, 1, 1], [], []>} : vector<16x32xbf16>, vector<32x50xbf16>, vector<16x50xf32> -> vector<16x50xf32>
    %c0_3 = arith.constant 0 : index
    %c0_4 = arith.constant 0 : index
    %3 = vector.load %arg3[%c0_3, %c0_4] : memref<1x50xf32, #tpu.memory_space<vmem>>, vector<1x50xf32>
    %4 = vector.broadcast %3 : vector<1x50xf32> to vector<16x50xf32>
    %5 = arith.addf %2, %4 : vector<16x50xf32>
    %cst_5 = arith.constant dense<0xFF800000> : vector<16xf32>
    %6 = vector.multi_reduction <maximumf>, %5, %cst_5 [1] : vector<16x50xf32> to vector<16xf32>
    %7 = vector.shape_cast %6 : vector<16xf32> to vector<16x1xf32>
    %8 = vector.broadcast %7 : vector<16x1xf32> to vector<16x50xf32>
    %9 = arith.subf %5, %8 : vector<16x50xf32>
    %10 = math.exp %9 : vector<16x50xf32>
    %cst_6 = arith.constant dense<0.000000e+00> : vector<16xf32>
    %11 = vector.multi_reduction <add>, %10, %cst_6 [1] : vector<16x50xf32> to vector<16xf32>
    %12 = vector.shape_cast %11 : vector<16xf32> to vector<16x1xf32>
    %13 = math.log %12 : vector<16x1xf32>
    %14 = vector.broadcast %13 : vector<16x1xf32> to vector<16x50xf32>
    %15 = arith.subf %9, %14 : vector<16x50xf32>
    %c0_7 = arith.constant 0 : index
    %c0_8 = arith.constant 0 : index
    %16 = vector.load %arg4[%c0_7, %c0_8] : memref<16x50xf32, #tpu.memory_space<vmem>>, vector<16x50xf32>
    tpu.vector_store %arg4[%c0_7, %c0_8], %15 {strides = array<i32>} : memref<16x50xf32, #tpu.memory_space<vmem>>, vector<16x50xf32>,
    return
  }
  func.func @transform_0(%arg0: i32) -> (i32, i32) {
    %c0_i32 = arith.constant 0 : i32
    %c0_i32_0 = arith.constant 0 : i32
    return %arg0, %c0_i32 : i32, i32
  }
  func.func @transform_1(%arg0: i32) -> (i32, i32) {
    %c0_i32 = arith.constant 0 : i32
    %c0_i32_0 = arith.constant 0 : i32
    %c0_i32_1 = arith.constant 0 : i32
    return %c0_i32, %c0_i32_0 : i32, i32
  }
  func.func @transform_2(%arg0: i32) -> (i32, i32) {
    %c0_i32 = arith.constant 0 : i32
    %c0_i32_0 = arith.constant 0 : i32
    %c0_i32_1 = arith.constant 0 : i32
    return %c0_i32, %c0_i32_0 : i32, i32
  }
  func.func @transform_3(%arg0: i32) -> (i32, i32) {
    %c0_i32 = arith.constant 0 : i32
    %c0_i32_0 = arith.constant 0 : i32
    return %arg0, %c0_i32 : i32, i32
  }
}

</mosaic_0001>

<bundles_post_ra>
// kernel: run.25
= control target key start
LH: loop header
LB: loop body
LE: loop exit
PB: predicated region body
PF: predicated region fallthrough
CT: control target
= control target key end

     0   :  { %v130_v0 = vmov 0.0   ;;  %vm131_vm0 = vmmov 0   ;;  %vm45_vm1 = vcmask 261120   ;;  %vm98_vm2 = vcmask 781312   ;;  %s170_s1 = inlined_call_operand.vmem [shape: bf16[32,96], index: 1, kind: input, shape index: {}]   ;;  %s171_s0 = inlined_call_operand.vmem [shape: bf16[16,32], index: 0, kind: input, shape index: {}]   ;;  %s172_s2 = inlined_call_operand.vmem [shape: f32[1,96], index: 2, kind: input, shape index: {}]   ;;  %s173_s3 = inlined_call_operand.vmem [shape: bf16[16,96], index: 3, kind: output, shape index: {}]  }
   0x1   :  { %117 = vmatprep.subr.bf16.mxu0 %v130_v0  ;;  %v127_v1 = vld [vmem:[%s170_s1] sm:$0xff]   ;;  %121 = vmatprep.mubr.msk.bf16.mxu0 %vm131_vm0, %v130_v0  ;;  %v128_v2 = vld [vmem:[%s170_s1 + $0x8] sm:$0xff]  }
   0x2   :  { %118 = vmatpush3.bf16.msra.mxu0 %v127_v1  ;;  %v129_v3 = vld [vmem:[%s171_s0] sm:$0xff]  }
   0x3   :  { %119 = vmatprep.subr.bf16.mxu0 %v130_v0  ;;  %v105_v4 = vld [vmem:[%s172_s2] ss:$0 sm:$0xff] }
   0x6   :  { %120 = vmatpush3.bf16.msra.mxu0 %v128_v2 }
   0x9   :  { %122 = vmatmul.mubr.msk.bf16.vlgmr.msra.gmra.mrb[0].mxu0 %vm45_vm1, %v129_v3 }
  0xdc   :  { %v83_v5 = vpop.f32.mrb[0].mxu0 }
  0xdd   :  { %v84_v6 = vadd.f32 %v105_v4, %v83_v5  ;;  %v123_v7 = vpop.f32.mrb[1].mxu0 }
  0xde   :  { %v86_v8 = vpop.f32.mrb[2].mxu0 }
  0xdf   :  { %v112_v9 = vpack.c.bf16 %v84_v6, %v84_v6  ;;  %v87_v10 = vadd.f32 %v105_v4, %v86_v8  ;;  %v124_v11 = vpop.f32.mrb[3].mxu0 }
  0xe1   :  { %99 = vst.msk [vmem:[%s173_s3] sm:$0xf] %vm98_vm2, %v112_v9  ;;  %v113_v12 = vpack.c.bf16 %v87_v10, %v87_v10 }
  0xe3   :  { %100 = vst.msk [vmem:[%s173_s3 + $0x4] sm:$0xf] %vm98_vm2, %v113_v12 }

// kernel: run.26
= control target key start
LH: loop header
LB: loop body
LE: loop exit
PB: predicated region body
PF: predicated region fallthrough
CT: control target
= control target key end

     0   :  { %s940_s9 = smov 0   ;;  %s942_s10 = smov 0   ;;  %s1043_s0 = inlined_call_operand.vmem [shape: bf16[2,8,96], index: 0, kind: input, shape index: {}, may-alias: {0,1}]   ;;  %s1044_s1 = inlined_call_operand.vmem [shape: bf16[2,8,96], index: 1, kind: input, shape index: {}, may-alias: {0,1}]   ;;  %s1045_s2 = inlined_call_operand.vmem [shape: bf16[2,8,32], index: 2, kind: output, shape index: {}]  }
   0x1   :  { %s944_s11 = smov 0  }
   0x2 LB: > { %s24_s12 = sadd.s32 1, %s903_s10  ;;  %p748_p0 = scmp.ge.s32.totalorder %s907_s11, 1  ;;  %s907_s11 = sphi %s944_s11, %s12_s11   ;;  %s903_s10 = sphi %s942_s10, %s1047_s10   ;;  %s899_s9 = sphi %s940_s9, %s1046_s9  }
   0x3   : > { %p26_p1 = scmp.ge.s32.totalorder %s24_s12, 2  ;;  %p139_p2 = scmp.lt.s32.totalorder %s907_s11, 3 }
   0x5   : > { %s1049_s12 = smov (%p26_p1, %s24_s12), 0  ;;  %p140_p3 = pnand %p748_p0, %p139_p2 }
   0x6   : > { %p169_p4 = scmp.lt.s32.totalorder (!%p140_p3), %s899_s9, 1  ;;  %v909_v0 = vmov (!%p140_p3), 0.0   ;;  %vm910_vm0 = vmmov (!%p140_p3), 0   ;;  %s911_s17 = smov (!%p140_p3), 96   ;;  %vm197_vm1 = vcmask (!%p140_p3), 64512   ;;  %vm261_vm2 = vcmask (!%p140_p3), 1043456  }
   0x7   : > { %143 = sbr.rel (%p140_p3) target bundleno = 1597 (0x63d), region = 28  ;;  %780 = vmatprep.subr.bf16.mxu0 (!%p140_p3), %v909_v0  ;;  %782 = vmatprep.mubr.msk.bf16.mxu0 (!%p140_p3), %vm910_vm0, %v909_v0  ;;  %s912_s21 = smov (!%p140_p3), 64   ;;  %vm651_vm3 = vcmask (!%p140_p3), 130048   ;;  %vm653_vm4 = vcmask (!%p140_p3), 195584   ;;  %vm656_vm5 = vcmask (!%p140_p3), 257024  }
   0x8   : > { %786 = vmatprep.subr.bf16.mxu1 (!%p140_p3), %v909_v0  ;;  %788 = vmatprep.mubr.msk.bf16.mxu1 (!%p140_p3), %vm910_vm0, %v909_v0  ;;  %s913_s22 = smov (!%p140_p3), 88   ;;  %s914_s23 = smov (!%p140_p3), 72  }
   0x9   : > { %s915_s24 = smov (!%p140_p3), 120   ;;  %s916_s25 = smov (!%p140_p3), 80  }
   0xa   : > { %s917_s26 = smov (!%p140_p3), 112   ;;  %s918_s27 = smov (!%p140_p3), 104  }
   0xb   : > { %s919_s28 = smov (!%p140_p3), 56   ;;  %s920_s29 = smov (!%p140_p3), 48  }
   0xc   : > { %s921_s30 = smov (!%p140_p3), 40   ;;  %s922_s3 = smov (!%p140_p3), 8  }
   0xd   : > { %s923_s4 = smov (!%p140_p3), 16   ;;  %s924_s5 = smov (!%p140_p3), 24  }
   0xe   : > { %s1051_s9 = smov (!%p169_p4, %s899_s9), 1 }
   0xf   : > { %s964_s13 = sshll.u32 %s1051_s9, 2 }
  0x10   : > { %s179_s16 = scalar_lea.vmem %s1044_s1, %s964_s13  ;;  %s175_s20 = scalar_lea.vmem %s1043_s0, %s964_s13 }
  0x11   : > { %v970_v1 = vld [vmem:[%s179_s16] ss:$0 sps:$4 sm:$0xff]   ;;  %s186_s8 = scalar_lea.vmem %s1045_s2, %s964_s13 }
  0x12   : > { %195 = vrot.lane.b32.xlu0 %v970_v1, %s911_s17  ;;  %v189_v4 = vld [vmem:[%s175_s20] sm:$0xf]  ;;  %256 = vrot.lane.b32.xlu1 %v970_v1, %s912_s21 }
  0x13   : > { %v191_v5 = vmul.bf16 1052065461, %v189_v4 }
  0x15   : > { %v755_v18 = vcombine.low %v191_v5, %v191_v5 }
  0x16   : > { %310 = vrot.lane.b32.xlu1 %v970_v1, %s913_s22 }
  0x84   : > { %v196_v2 = vpop.permute.xlu0 %195  ;;  %v257_v11 = vpop.permute.xlu1 %256 }
  0x85   : > { %v202_v3 = vsel %vm197_vm1, %v196_v2, 0  ;;  %v263_v12 = vsel %vm261_vm2, %v257_v11, 0 }
  0x86   : > { %781 = vmatpush3.bf16.xpose.msra.mxu0 %v202_v3  ;;  %787 = vmatpush3.bf16.msra.mxu1 %v263_v12 }
  0x87   : > { %798 = vmatprep.subr.bf16.mxu0 %v909_v0  ;;  %792 = vmatprep.subr.bf16.mxu1 %v909_v0 }
  0x88   : > { %v311_v19 = vpop.permute.xlu1 %310 }
  0x89   : > { %v316_v25 = vsel %vm197_vm1, %v311_v19, 0 }
  0x8d   : > { %783 = vmatmul.mubr.msk.bf16.vlgmr.msra.gmra.mrb[0].mxu0 %vm197_vm1, %v191_v5 }
  0x8e   : > { %800 = vmatprep.mubr.msk.bf16.mxu0 %vm910_vm0, %v909_v0 }
 0x160   : > { %v238_v6 = vpop.f32.mrb[0].mxu0 }
 0x161   : > { %v784_v7 = vpop.f32.mrb[1].mxu0  ;;  %v244_v8 = vsel %vm197_vm1, %v238_v6, -inf }
 0x162   : > { %245 = vmax.xlane.f32.xlu0 %v244_v8  ;;  %v241_v9 = vpop.f32.mrb[2].mxu0 }
 0x163   : > { %v785_v10 = vpop.f32.mrb[3].mxu0 }
 0x178   : > { %530 = vrot.lane.b32.xlu0 %v970_v1, %s914_s23 }
 0x1ef   : > { %v246_v13 = vpop.xlane.xlu0 %245 }
 0x1f0   : > { %v247_v14 = vsub.f32 %v238_v6, %v246_v13 }
 0x1f2   : > { %v248_v15 = vmul.f32 1.442695, %v247_v14 }
 0x1f3   : > { %v531_v28 = vpop.permute.xlu0 %530 }
 0x1f4   : > { %869 = vpow2.f32 %v248_v15  ;;  %v536_v30 = vsel %vm197_vm1, %v531_v28, 0 }
 0x1fe   : > { %v870_v16 = vpop.eup %869 }
 0x1ff   : > { %v250_v17 = vsel %vm197_vm1, %v870_v16, 0.0 }
 0x200   : > { %251 = vadd.xlane.f32.xlu1 %v250_v17 }
 0x211   : > { %308 = vrot.lane.b32.xlu1 %v755_v18, %s915_s24 }
 0x215   : > { %420 = vrot.lane.b32.xlu1 %v970_v1, %s916_s25 }
 0x219   : > { %418 = vrot.lane.b32.xlu1 %v755_v18, %s917_s26 }
 0x21d   : > { %528 = vrot.lane.b32.xlu1 %v755_v18, %s918_s27 }
 0x28d   : > { %v252_v20 = vpop.xlane.xlu1 %251 }
 0x28e   : > { %871 = vrcp.f32 %v252_v20 }
 0x291   : > { %v309_v23 = vpop.permute.xlu1 %308 }
 0x295   : > { %v421_v26 = vpop.permute.xlu1 %420 }
 0x296   : > { %v426_v27 = vsel %vm197_vm1, %v421_v26, 0 }
 0x298   : > { %v872_v21 = vpop.eup %871 }
 0x299   : > { %v254_v22 = vmul.f32 %v872_v21, %v870_v16  ;;  %v419_v29 = vpop.permute.xlu1 %418 }
 0x29b   : > { %v255_v24 = vpack.c.bf16 %v254_v22, %v254_v22 }
 0x29d   : > { %789 = vmatmul.mubr.msk.bf16.vlgmr.msra.gmra.mrb[0].mxu1 %vm197_vm1, %v255_v24  ;;  %v529_v31 = vpop.permute.xlu1 %528 }
 0x29e   : > { %793 = vmatpush3.bf16.xpose.msra.mxu1 %v316_v25  ;;  %794 = vmatprep.mubr.msk.bf16.mxu1 %vm910_vm0, %v909_v0 }
 0x29f   : > { %804 = vmatprep.subr.bf16.mxu1 %v909_v0 }
 0x2a5   : > { %795 = vmatmul.mubr.msk.bf16.vlgmr.msra.gmra.mrb[4].mxu1 %vm197_vm1, %v309_v23 }
 0x2a6   : > { %805 = vmatpush3.bf16.xpose.msra.mxu1 %v426_v27  ;;  %806 = vmatprep.mubr.msk.bf16.mxu1 %vm910_vm0, %v909_v0 }
 0x2a7   : > { %816 = vmatprep.subr.bf16.mxu1 %v909_v0 }
 0x2ad   : > { %807 = vmatmul.mubr.msk.bf16.vlgmr.msra.gmra.mrb[8].mxu1 %vm197_vm1, %v419_v29 }
 0x2ae   : > { %817 = vmatpush3.bf16.xpose.msra.mxu1 %v536_v30  ;;  %818 = vmatprep.mubr.msk.bf16.mxu1 %vm910_vm0, %v909_v0 }
 0x2b5   : > { %819 = vmatmul.mubr.msk.bf16.vlgmr.msra.gmra.mrb[12].mxu1 %vm197_vm1, %v529_v31 }
 0x370   : > { %v1005_v32 = vpop.f32.mrb[0].mxu1 }
 0x371   : > { %v790_v33 = vpop.f32.mrb[1].mxu1 }
 0x372   : > { %v302_v34 = vpop.f32.mrb[2].mxu1 }
 0x373   : > { %v791_v35 = vpop.f32.mrb[3].mxu1 }
 0x378   : > { %v352_v36 = vpop.f32.mrb[4].mxu1 }
 0x379   : > { %v796_v37 = vpop.f32.mrb[5].mxu1  ;;  %v358_v38 = vsel %vm197_vm1, %v352_v36, -inf }
 0x37a   : > { %359 = vmax.xlane.f32.xlu1 %v358_v38  ;;  %v355_v39 = vpop.f32.mrb[6].mxu1 }
 0x37b   : > { %v797_v40 = vpop.f32.mrb[7].mxu1 }
 0x380   : > { %v462_v41 = vpop.f32.mrb[8].mxu1 }
 0x381   : > { %v468_v42 = vsel %vm197_vm1, %v462_v41, -inf  ;;  %v808_v43 = vpop.f32.mrb[9].mxu1 }
 0x382   : > { %469 = vmax.xlane.f32.xlu0 %v468_v42  ;;  %v465_v44 = vpop.f32.mrb[10].mxu1 }
 0x383   : > { %v809_v45 = vpop.f32.mrb[11].mxu1 }
 0x388   : > { %v572_v46 = vpop.f32.mrb[12].mxu1 }
 0x389   : > { %v578_v47 = vsel %vm197_vm1, %v572_v46, -inf  ;;  %v820_v48 = vpop.f32.mrb[13].mxu1 }
 0x38a   : > { %579 = vmax.xlane.f32.xlu1 %v578_v47  ;;  %v575_v49 = vpop.f32.mrb[14].mxu1 }
 0x38b   : > { %v821_v50 = vpop.f32.mrb[15].mxu1 }
 0x407   : > { %v360_v51 = vpop.xlane.xlu1 %359 }
 0x408   : > { %v361_v52 = vsub.f32 %v352_v36, %v360_v51 }
 0x40a   : > { %v362_v53 = vmul.f32 1.442695, %v361_v52 }
 0x40c   : > { %873 = vpow2.f32 %v362_v53 }
 0x40f   : > { %v470_v61 = vpop.xlane.xlu0 %469 }
 0x410   : > { %v471_v62 = vsub.f32 %v462_v41, %v470_v61 }
 0x412   : > { %v472_v63 = vmul.f32 1.442695, %v471_v62 }
 0x416   : > { %v874_v54 = vpop.eup %873 }
 0x417   : > { %v580_v55 = vpop.xlane.xlu1 %579  ;;  %v364_v56 = vsel %vm197_vm1, %v874_v54, 0.0 }
 0x418   : > { %v581_v57 = vsub.f32 %v572_v46, %v580_v55  ;;  %365 = vadd.xlane.f32.xlu1 %v364_v56 }
 0x41a   : > { %v582_v58 = vmul.f32 1.442695, %v581_v57 }
 0x41c   : > { %875 = vpow2.f32 %v582_v58 }
 0x41d   : > { %877 = vpow2.f32 %v472_v63 }
 0x426   : > { %v876_v59 = vpop.eup %875 }
 0x427   : > { %v584_v60 = vsel %vm197_vm1, %v876_v59, 0.0  ;;  %v878_v2 = vpop.eup %877 }
 0x428   : > { %585 = vadd.xlane.f32.xlu0 %v584_v60  ;;  %v474_v3 = vsel %vm197_vm1, %v878_v2, 0.0 }
 0x429   : > { %370 = vrot.lane.b32.xlu1 %v970_v1, %s919_s28 }
 0x43e   : > { %480 = vrot.lane.b32.xlu0 %v970_v1, %s920_s29 }
 0x44d   : > { %475 = vadd.xlane.f32.xlu1 %v474_v3 }
 0x45e   : > { %590 = vrot.lane.b32.xlu1 %v970_v1, %s921_s30 }
 0x4a5   : > { %v366_v4 = vpop.xlane.xlu1 %365 }
 0x4a6   : > { %879 = vrcp.f32 %v366_v4 }
 0x4a9   : > { %v371_v5 = vpop.permute.xlu1 %370 }
 0x4aa   : > { %v376_v6 = vsel %vm261_vm2, %v371_v5, 0 }
 0x4ab   : > { %799 = vmatpush3.bf16.msra.mxu0 %v376_v6 }
 0x4ac   : > { %810 = vmatprep.subr.bf16.mxu0 %v909_v0 }
 0x4b0   : > { %v880_v7 = vpop.eup %879 }
 0x4b1   : > { %v368_v8 = vmul.f32 %v880_v7, %v874_v54 }
 0x4b3   : > { %v369_v9 = vpack.c.bf16 %v368_v8, %v368_v8 }
 0x4b5   : > { %801 = vmatmul.mubr.msk.bf16.vlgmr.msra.gmra.mrb[4].mxu0 %vm197_vm1, %v369_v9  ;;  %v586_v10 = vpop.xlane.xlu0 %585 }
 0x4b6   : > { %812 = vmatprep.mubr.msk.bf16.mxu0 %vm910_vm0, %v909_v0 }
 0x4b9   : > { %v481_v11 = vpop.permute.xlu0 %480 }
 0x4ba   : > { %v486_v1 = vsel %vm261_vm2, %v481_v11, 0 }
 0x4bb   : > { %811 = vmatpush3.bf16.msra.mxu0 %v486_v1 }
 0x4bc   : > { %822 = vmatprep.subr.bf16.mxu0 %v909_v0 }
 0x4da   : > { %v476_v12 = vpop.xlane.xlu1 %475 }
 0x4db   : > { %881 = vrcp.f32 %v476_v12 }
 0x4dc   : > { %883 = vrcp.f32 %v586_v10 }
 0x4de   : > { %v591_v14 = vpop.permute.xlu1 %590 }
 0x4df   : > { %v596_v16 = vsel %vm261_vm2, %v591_v14, 0 }
 0x4e5   : > { %v882_v13 = vpop.eup %881 }
 0x4e6   : > { %v478_v15 = vmul.f32 %v882_v13, %v878_v2  ;;  %v884_v18 = vpop.eup %883 }
 0x4e7   : > { %v588_v19 = vmul.f32 %v884_v18, %v876_v59 }
 0x4e8   : > { %v479_v17 = vpack.c.bf16 %v478_v15, %v478_v15 }
 0x4e9   : > { %v589_v20 = vpack.c.bf16 %v588_v19, %v588_v19 }
 0x4ea   : > { %813 = vmatmul.mubr.msk.bf16.vlgmr.msra.gmra.mrb[8].mxu0 %vm197_vm1, %v479_v17 }
 0x4eb   : > { %823 = vmatpush3.bf16.msra.mxu0 %v596_v16  ;;  %824 = vmatprep.mubr.msk.bf16.mxu0 %vm910_vm0, %v909_v0 }
 0x4f2   : > { %825 = vmatmul.mubr.msk.bf16.vlgmr.msra.gmra.mrb[12].mxu0 %vm197_vm1, %v589_v20 }
 0x588   : > { %v412_v21 = vpop.f32.mrb[4].mxu0 }
 0x589   : > { %639 = vrot.lane.b32.xlu1 %v412_v21, %s922_s3  ;;  %v802_v22 = vpop.f32.mrb[5].mxu0 }
 0x58a   : > { %v415_v23 = vpop.f32.mrb[6].mxu0 }
 0x58b   : > { %v803_v24 = vpop.f32.mrb[7].mxu0 }
 0x5bd   : > { %v522_v25 = vpop.f32.mrb[8].mxu0 }
 0x5be   : > { %643 = vrot.lane.b32.xlu0 %v522_v25, %s923_s4  ;;  %v814_v26 = vpop.f32.mrb[9].mxu0 }
 0x5bf   : > { %v525_v27 = vpop.f32.mrb[10].mxu0 }
 0x5c0   : > { %v815_v28 = vpop.f32.mrb[11].mxu0 }
 0x5c5   : > { %v632_v29 = vpop.f32.mrb[12].mxu0 }
 0x5c6   : > { %647 = vrot.lane.b32.xlu1 %v632_v29, %s924_s5  ;;  %v826_v0 = vpop.f32.mrb[13].mxu0 }
 0x5c7   : > { %v635_v30 = vpop.f32.mrb[14].mxu0 }
 0x5c8   : > { %v827_v31 = vpop.f32.mrb[15].mxu0 }
 0x5fb   : > { %v640_v33 = vpop.permute.xlu1 %639 }
 0x5fc   : > { %v650_v35 = vsel %vm197_vm1, %v1005_v32, %v640_v33 }
 0x630   : > { %v644_v34 = vpop.permute.xlu0 %643 }
 0x631   : > { %v652_v36 = vsel %vm651_vm3, %v650_v35, %v644_v34 }
 0x638   : > { %v648_v37 = vpop.permute.xlu1 %647 }
 0x639   : > { %v654_v38 = vsel %vm653_vm4, %v652_v36, %v648_v37 }
 0x63a   : > { %v655_v39 = vpack.c.bf16 %v654_v38, %v654_v38 }
 0x63c   : > { %657 = vst.msk [vmem:[%s186_s8] sm:$0xf] %vm656_vm5, %v655_v39 }
 0x63d PF: > { %s12_s11 = sadd.s32 1, %s907_s11   ;;  %s1046_s9 = smov %s903_s10 }
 0x63e   : > { %p9_p5 = scmp.ge.s32.totalorder %s12_s11, 4   ;;  %s1047_s10 = smov %s1049_s12 }
 0x640   :  { %11 = sbr.rel (!%p9_p5) target bundleno = 2 (0x2), region = 61 }

// kernel: run.27
= control target key start
LH: loop header
LB: loop body
LE: loop exit
PB: predicated region body
PF: predicated region fallthrough
CT: control target
= control target key end

     0   :  { %v200_v0 = vmov 0.0   ;;  %vm201_vm0 = vmmov 0   ;;  %vm54_vm1 = vcmask 261120   ;;  %vm158_vm2 = vcmask 257024   ;;  %s269_s1 = inlined_call_operand.vmem [shape: bf16[32,32], index: 1, kind: input, shape index: {}]   ;;  %s270_s0 = inlined_call_operand.vmem [shape: bf16[16,32], index: 0, kind: input, shape index: {}]   ;;  %s271_s3 = inlined_call_operand.vmem [shape: bf16[16,32], index: 3, kind: input, shape index: {}]   ;;  %s272_s2 = inlined_call_operand.vmem [shape: f32[1,32], index: 2, kind: input, shape index: {}]   ;;  %s273_s4 = inlined_call_operand.vmem [shape: f32[1,32], index: 4, kind: input, shape index: {}]   ;;  %s274_s5 = inlined_call_operand.vmem [shape: f32[1,32], index: 5, kind: input, shape index: {}]   ;;  %s275_s6 = inlined_call_operand.vmem [shape: bf16[16,32], index: 6, kind: output, shape index: {}]  }
   0x1   :  { %183 = vmatprep.subr.bf16.mxu0 %v200_v0  ;;  %v193_v1 = vld [vmem:[%s269_s1] sm:$0xff]   ;;  %187 = vmatprep.mubr.msk.bf16.mxu0 %vm201_vm0, %v200_v0  ;;  %v194_v2 = vld [vmem:[%s269_s1 + $0x8] sm:$0xff]  }
   0x2   :  { %184 = vmatpush3.bf16.msra.mxu0 %v193_v1  ;;  %v195_v3 = vld [vmem:[%s270_s0] sm:$0xff]  }
   0x3   :  { %185 = vmatprep.subr.bf16.mxu0 %v200_v0  ;;  %v177_v4 = vld [vmem:[%s271_s3] sm:$0xff]  }
   0x4   :  { %v165_v5 = vld [vmem:[%s272_s2] ss:$0 sm:$0xff]  ;;  %v178_v6 = vunpack.c.l.bf16 %v177_v4  ;;  %v179_v10 = vunpack.c.h.bf16 %v177_v4 }
   0x5   :  { %v170_v35 = vld [vmem:[%s273_s4] ss:$0 sm:$0xff] }
   0x6   :  { %186 = vmatpush3.bf16.msra.mxu0 %v194_v2  ;;  %v171_v37 = vld [vmem:[%s274_s5] ss:$0 sm:$0xff] }
   0x9   :  { %188 = vmatmul.mubr.msk.bf16.vlgmr.msra.gmra.mrb[0].mxu0 %vm54_vm1, %v195_v3 }
  0xdc   :  { %v92_v7 = vpop.f32.mrb[0].mxu0 }
  0xdd   :  { %v93_v8 = vadd.f32 %v165_v5, %v92_v7  ;;  %v189_v9 = vpop.f32.mrb[1].mxu0 }
  0xde   :  { %v95_v11 = vpop.f32.mrb[2].mxu0 }
  0xdf   :  { %v96_v12 = vadd.f32 %v165_v5, %v95_v11  ;;  %v190_v13 = vpop.f32.mrb[3].mxu0  ;;  %v103_v14 = vadd.f32 %v178_v6, %v93_v8 }
  0xe1   :  { %v105_v15 = vsel %vm54_vm1, %v103_v14, 0.0  ;;  %v104_v16 = vadd.f32 %v179_v10, %v96_v12 }
  0xe2   :  { %106 = vadd.xlane.f32.xlu0 %v105_v15 }
  0xe3   :  { %v108_v17 = vsel %vm54_vm1, %v104_v16, 0.0 }
  0xe6   :  { %109 = vadd.xlane.f32.xlu0 %v108_v17 }
 0x16f   :  { %v107_v18 = vpop.xlane.xlu0 %106 }
 0x170   :  { %v112_v19 = vmul.f32 0.03125, %v107_v18 }
 0x172   :  { %v114_v20 = vsub.f32 %v103_v14, %v112_v19 }
 0x173   :  { %v110_v21 = vpop.xlane.xlu0 %109 }
 0x174   :  { %v113_v22 = vmul.f32 0.03125, %v110_v21  ;;  %v116_v23 = vmul.f32 %v114_v20, %v114_v20 }
 0x176   :  { %v115_v24 = vsub.f32 %v104_v16, %v113_v22  ;;  %v118_v25 = vsel %vm54_vm1, %v116_v23, 0.0 }
 0x177   :  { %119 = vadd.xlane.f32.xlu1 %v118_v25 }
 0x178   :  { %v117_v26 = vmul.f32 %v115_v24, %v115_v24 }
 0x17a   :  { %v121_v27 = vsel %vm54_vm1, %v117_v26, 0.0 }
 0x17b   :  { %122 = vadd.xlane.f32.xlu1 %v121_v27 }
 0x204   :  { %v120_v28 = vpop.xlane.xlu1 %119 }
 0x205   :  { %v124_v29 = vmul.f32 0.03125, %v120_v28 }
 0x207   :  { %v126_v30 = vadd.f32 1e-05, %v124_v29 }
 0x208   :  { %v123_v31 = vpop.xlane.xlu1 %122 }
 0x209   :  { %196 = vrsqrt.f32 %v126_v30  ;;  %v125_v32 = vmul.f32 0.03125, %v123_v31 }
 0x20b   :  { %v127_v33 = vadd.f32 1e-05, %v125_v32 }
 0x20d   :  { %198 = vrsqrt.f32 %v127_v33 }
 0x213   :  { %v197_v34 = vpop.eup %196 }
 0x214   :  { %v130_v36 = vmul.f32 %v197_v34, %v114_v20 }
 0x216   :  { %v139_v38 = vmul.f32 %v170_v35, %v130_v36 }
 0x217   :  { %v199_v39 = vpop.eup %198 }
 0x218   :  { %v148_v40 = vadd.f32 %v171_v37, %v139_v38  ;;  %v131_v41 = vmul.f32 %v199_v39, %v115_v24 }
 0x21a   :  { %v174_v42 = vpack.c.bf16 %v148_v40, %v148_v40  ;;  %v140_v43 = vmul.f32 %v170_v35, %v131_v41 }
 0x21c   :  { %159 = vst.msk [vmem:[%s275_s6] sm:$0xf] %vm158_vm2, %v174_v42  ;;  %v149_v44 = vadd.f32 %v171_v37, %v140_v43 }
 0x21e   :  { %v175_v45 = vpack.c.bf16 %v149_v44, %v149_v44 }
 0x220   :  { %160 = vst.msk [vmem:[%s275_s6 + $0x4] sm:$0xf] %vm158_vm2, %v175_v45 }

// kernel: run.28
= control target key start
LH: loop header
LB: loop body
LE: loop exit
PB: predicated region body
PF: predicated region fallthrough
CT: control target
= control target key end

     0   :  { %v312_v0 = vmov 0.0   ;;  %vm313_vm0 = vmmov 0   ;;  %vm57_vm1 = vcmask 261120   ;;  %vm144_vm2 = vcmask 523264   ;;  %s398_s1 = inlined_call_operand.vmem [shape: bf16[32,64], index: 1, kind: input, shape index: {}]   ;;  %s399_s0 = inlined_call_operand.vmem [shape: bf16[16,32], index: 0, kind: input, shape index: {}]   ;;  %s400_s3 = inlined_call_operand.vmem [shape: bf16[64,32], index: 3, kind: input, shape index: {}]   ;;  %s401_s2 = inlined_call_operand.vmem [shape: f32[1,64], index: 2, kind: input, shape index: {}]   ;;  %s402_s4 = inlined_call_operand.vmem [shape: f32[1,32], index: 4, kind: input, shape index: {}]   ;;  %s403_s5 = inlined_call_operand.vmem [shape: f32[1,32], index: 5, kind: input, shape index: {}]   ;;  %s404_s6 = inlined_call_operand.vmem [shape: f32[1,32], index: 6, kind: input, shape index: {}]   ;;  %s405_s7 = inlined_call_operand.vmem [shape: bf16[16,32], index: 7, kind: output, shape index: {}]  }
   0x1   :  { %278 = vmatprep.subr.bf16.mxu0 %v312_v0  ;;  %v300_v1 = vld [vmem:[%s398_s1] sm:$0xff]   ;;  %282 = vmatprep.mubr.msk.bf16.mxu0 %vm313_vm0, %v312_v0  ;;  %v301_v2 = vld [vmem:[%s398_s1 + $0x8] sm:$0xff]   ;;  %v305_v6 = vld [vmem:[%s400_s3 + $0x10] sm:$0xff]   ;;  %vm246_vm3 = vcmask 257024  }
   0x2   :  { %286 = vmatprep.subr.bf16.mxu1 %v312_v0  ;;  %294 = vmatprep.mubr.msk.bf16.mxu1 %vm313_vm0, %v312_v0  ;;  %v27_v3 = vld [vmem:[%s399_s0] sm:$0xff]   ;;  %v304_v5 = vld [vmem:[%s400_s3 + $0x8] sm:$0xff]   ;;  %v306_v7 = vld [vmem:[%s400_s3 + $0x18] sm:$0xff]  }
   0x3   :  { %279 = vmatpush3.bf16.msra.mxu0 %v300_v1  ;;  %v303_v4 = vld [vmem:[%s400_s3] sm:$0xff]   ;;  %v189_v19 = vunpack.c.l.bf16 %v27_v3  ;;  %v190_v23 = vunpack.c.h.bf16 %v27_v3 }
   0x4   :  { %280 = vmatprep.subr.bf16.mxu0 %v312_v0  ;;  %287 = vmatpush3.bf16.msra.mxu1 %v303_v4  ;;  %v253_v8 = vld [vmem:[%s401_s2] ss:$0 sm:$0xff] }
   0x5   :  { %288 = vmatprep.subr.bf16.mxu1 %v312_v0  ;;  %v258_v18 = vld [vmem:[%s402_s4] ss:$0 sm:$0xff] }
   0x6   :  { %v264_v48 = vld [vmem:[%s403_s5] ss:$0 sm:$0xff] }
   0x7   :  { %281 = vmatpush3.bf16.msra.mxu0 %v301_v2  ;;  %v265_v50 = vld [vmem:[%s404_s6] ss:$0 sm:$0xff] }
   0x8   :  { %289 = vmatpush3.bf16.msra.mxu1 %v304_v5 }
   0x9   :  { %290 = vmatprep.subr.bf16.mxu1 %v312_v0 }
   0xa   :  { %283 = vmatmul.mubr.msk.bf16.vlgmr.msra.gmra.mrb[0].mxu0 %vm57_vm1, %v27_v3 }
   0xc   :  { %291 = vmatpush3.bf16.msra.mxu1 %v305_v6 }
   0xd   :  { %292 = vmatprep.subr.bf16.mxu1 %v312_v0 }
  0x10   :  { %293 = vmatpush3.bf16.msra.mxu1 %v306_v7 }
  0xdd   :  { %v95_v9 = vpop.f32.mrb[0].mxu0 }
  0xde   :  { %v96_v10 = vadd.f32 %v253_v8, %v95_v9  ;;  %v284_v11 = vpop.f32.mrb[1].mxu0 }
  0xdf   :  { %v98_v12 = vpop.f32.mrb[2].mxu0 }
  0xe0   :  { %v99_v13 = vadd.f32 %v253_v8, %v98_v12  ;;  %v285_v14 = vpop.f32.mrb[3].mxu0  ;;  %v102_v15 = vmax.f32 %v96_v10, 0.0 }
  0xe2   :  { %v103_v16 = vmax.f32 %v99_v13, 0.0 }
  0xe4   :  { %v104_v17 = vpack.c.bf16 %v103_v16, %v102_v15 }
  0xe6   :  { %295 = vmatmul.mubr.msk.bf16.vlgmr.msra.gmra.mrb[0].mxu1 %vm144_vm2, %v104_v17 }
 0x1b9   :  { %v182_v20 = vpop.f32.mrb[0].mxu1 }
 0x1ba   :  { %v183_v21 = vadd.f32 %v258_v18, %v182_v20  ;;  %v296_v22 = vpop.f32.mrb[1].mxu1 }
 0x1bb   :  { %v185_v24 = vpop.f32.mrb[2].mxu1 }
 0x1bc   :  { %v186_v25 = vadd.f32 %v258_v18, %v185_v24  ;;  %v297_v26 = vpop.f32.mrb[3].mxu1  ;;  %v191_v27 = vadd.f32 %v189_v19, %v183_v21 }
 0x1be   :  { %v193_v28 = vsel %vm57_vm1, %v191_v27, 0.0  ;;  %v192_v29 = vadd.f32 %v190_v23, %v186_v25 }
 0x1bf   :  { %194 = vadd.xlane.f32.xlu0 %v193_v28 }
 0x1c0   :  { %v196_v30 = vsel %vm57_vm1, %v192_v29, 0.0 }
 0x1c3   :  { %197 = vadd.xlane.f32.xlu0 %v196_v30 }
 0x24c   :  { %v195_v31 = vpop.xlane.xlu0 %194 }
 0x24d   :  { %v200_v32 = vmul.f32 0.03125, %v195_v31 }
 0x24f   :  { %v202_v33 = vsub.f32 %v191_v27, %v200_v32 }
 0x250   :  { %v198_v34 = vpop.xlane.xlu0 %197 }
 0x251   :  { %v201_v35 = vmul.f32 0.03125, %v198_v34  ;;  %v204_v36 = vmul.f32 %v202_v33, %v202_v33 }
 0x253   :  { %v203_v37 = vsub.f32 %v192_v29, %v201_v35  ;;  %v206_v38 = vsel %vm57_vm1, %v204_v36, 0.0 }
 0x254   :  { %207 = vadd.xlane.f32.xlu1 %v206_v38 }
 0x255   :  { %v205_v39 = vmul.f32 %v203_v37, %v203_v37 }
 0x257   :  { %v209_v40 = vsel %vm57_vm1, %v205_v39, 0.0 }
 0x258   :  { %210 = vadd.xlane.f32.xlu1 %v209_v40 }
 0x2e1   :  { %v208_v41 = vpop.xlane.xlu1 %207 }
 0x2e2   :  { %v212_v42 = vmul.f32 0.03125, %v208_v41 }
 0x2e4   :  { %v214_v43 = vadd.f32 1e-05, %v212_v42 }
 0x2e5   :  { %v211_v44 = vpop.xlane.xlu1 %210 }
 0x2e6   :  { %308 = vrsqrt.f32 %v214_v43  ;;  %v213_v45 = vmul.f32 0.03125, %v211_v44 }
 0x2e8   :  { %v215_v46 = vadd.f32 1e-05, %v213_v45 }
 0x2ea   :  { %310 = vrsqrt.f32 %v215_v46 }
 0x2f0   :  { %v309_v47 = vpop.eup %308 }
 0x2f1   :  { %v218_v49 = vmul.f32 %v309_v47, %v202_v33 }
 0x2f3   :  { %v227_v51 = vmul.f32 %v264_v48, %v218_v49 }
 0x2f4   :  { %v311_v52 = vpop.eup %310 }
 0x2f5   :  { %v236_v53 = vadd.f32 %v265_v50, %v227_v51  ;;  %v219_v54 = vmul.f32 %v311_v52, %v203_v37 }
 0x2f7   :  { %v268_v55 = vpack.c.bf16 %v236_v53, %v236_v53  ;;  %v228_v56 = vmul.f32 %v264_v48, %v219_v54 }
 0x2f9   :  { %247 = vst.msk [vmem:[%s405_s7] sm:$0xf] %vm246_vm3, %v268_v55  ;;  %v237_v57 = vadd.f32 %v265_v50, %v228_v56 }
 0x2fb   :  { %v269_v58 = vpack.c.bf16 %v237_v57, %v237_v57 }
 0x2fd   :  { %248 = vst.msk [vmem:[%s405_s7 + $0x4] sm:$0xf] %vm246_vm3, %v269_v58 }

// kernel: run.37
= control target key start
LH: loop header
LB: loop body
LE: loop exit
PB: predicated region body
PF: predicated region fallthrough
CT: control target
= control target key end

     0   :  { %v130_v0 = vmov 0.0   ;;  %vm131_vm0 = vmmov 0   ;;  %vm45_vm1 = vcmask 261120   ;;  %vm98_vm2 = vcmask 519168   ;;  %s170_s1 = inlined_call_operand.vmem [shape: bf16[32,64], index: 1, kind: input, shape index: {}]   ;;  %s171_s0 = inlined_call_operand.vmem [shape: bf16[16,32], index: 0, kind: input, shape index: {}]   ;;  %s172_s2 = inlined_call_operand.vmem [shape: f32[1,64], index: 2, kind: input, shape index: {}]   ;;  %s173_s3 = inlined_call_operand.vmem [shape: bf16[16,64], index: 3, kind: output, shape index: {}]  }
   0x1   :  { %117 = vmatprep.subr.bf16.mxu0 %v130_v0  ;;  %v127_v1 = vld [vmem:[%s170_s1] sm:$0xff]   ;;  %121 = vmatprep.mubr.msk.bf16.mxu0 %vm131_vm0, %v130_v0  ;;  %v128_v2 = vld [vmem:[%s170_s1 + $0x8] sm:$0xff]  }
   0x2   :  { %118 = vmatpush3.bf16.msra.mxu0 %v127_v1  ;;  %v129_v3 = vld [vmem:[%s171_s0] sm:$0xff]  }
   0x3   :  { %119 = vmatprep.subr.bf16.mxu0 %v130_v0  ;;  %v105_v4 = vld [vmem:[%s172_s2] ss:$0 sm:$0xff] }
   0x6   :  { %120 = vmatpush3.bf16.msra.mxu0 %v128_v2 }
   0x9   :  { %122 = vmatmul.mubr.msk.bf16.vlgmr.msra.gmra.mrb[0].mxu0 %vm45_vm1, %v129_v3 }
  0xdc   :  { %v83_v5 = vpop.f32.mrb[0].mxu0 }
  0xdd   :  { %v84_v6 = vadd.f32 %v105_v4, %v83_v5  ;;  %v123_v7 = vpop.f32.mrb[1].mxu0 }
  0xde   :  { %v86_v8 = vpop.f32.mrb[2].mxu0 }
  0xdf   :  { %v112_v9 = vpack.c.bf16 %v84_v6, %v84_v6  ;;  %v87_v10 = vadd.f32 %v105_v4, %v86_v8  ;;  %v124_v11 = vpop.f32.mrb[3].mxu0 }
  0xe1   :  { %99 = vst.msk [vmem:[%s173_s3] sm:$0xf] %vm98_vm2, %v112_v9  ;;  %v113_v12 = vpack.c.bf16 %v87_v10, %v87_v10 }
  0xe3   :  { %100 = vst.msk [vmem:[%s173_s3 + $0x4] sm:$0xf] %vm98_vm2, %v113_v12 }

// kernel: run.36
= control target key start
LH: loop header
LB: loop body
LE: loop exit
PB: predicated region body
PF: predicated region fallthrough
CT: control target
= control target key end

     0   :  { %v130_v0 = vmov 0.0   ;;  %vm131_vm0 = vmmov 0   ;;  %vm45_vm1 = vcmask 261120   ;;  %vm98_vm2 = vcmask 257024   ;;  %s170_s1 = inlined_call_operand.vmem [shape: bf16[32,32], index: 1, kind: input, shape index: {}]   ;;  %s171_s0 = inlined_call_operand.vmem [shape: bf16[16,32], index: 0, kind: input, shape index: {}]   ;;  %s172_s2 = inlined_call_operand.vmem [shape: f32[1,32], index: 2, kind: input, shape index: {}]   ;;  %s173_s3 = inlined_call_operand.vmem [shape: bf16[16,32], index: 3, kind: output, shape index: {}]  }
   0x1   :  { %117 = vmatprep.subr.bf16.mxu0 %v130_v0  ;;  %v127_v1 = vld [vmem:[%s170_s1] sm:$0xff]   ;;  %121 = vmatprep.mubr.msk.bf16.mxu0 %vm131_vm0, %v130_v0  ;;  %v128_v2 = vld [vmem:[%s170_s1 + $0x8] sm:$0xff]  }
   0x2   :  { %118 = vmatpush3.bf16.msra.mxu0 %v127_v1  ;;  %v129_v3 = vld [vmem:[%s171_s0] sm:$0xff]  }
   0x3   :  { %119 = vmatprep.subr.bf16.mxu0 %v130_v0  ;;  %v105_v4 = vld [vmem:[%s172_s2] ss:$0 sm:$0xff] }
   0x6   :  { %120 = vmatpush3.bf16.msra.mxu0 %v128_v2 }
   0x9   :  { %122 = vmatmul.mubr.msk.bf16.vlgmr.msra.gmra.mrb[0].mxu0 %vm45_vm1, %v129_v3 }
  0xdc   :  { %v83_v5 = vpop.f32.mrb[0].mxu0 }
  0xdd   :  { %v84_v6 = vadd.f32 %v105_v4, %v83_v5  ;;  %v123_v7 = vpop.f32.mrb[1].mxu0 }
  0xde   :  { %v86_v8 = vpop.f32.mrb[2].mxu0 }
  0xdf   :  { %v112_v9 = vpack.c.bf16 %v84_v6, %v84_v6  ;;  %v87_v10 = vadd.f32 %v105_v4, %v86_v8  ;;  %v124_v11 = vpop.f32.mrb[3].mxu0 }
  0xe1   :  { %99 = vst.msk [vmem:[%s173_s3] sm:$0xf] %vm98_vm2, %v112_v9  ;;  %v113_v12 = vpack.c.bf16 %v87_v10, %v87_v10 }
  0xe3   :  { %100 = vst.msk [vmem:[%s173_s3 + $0x4] sm:$0xf] %vm98_vm2, %v113_v12 }

// kernel: run.38
= control target key start
LH: loop header
LB: loop body
LE: loop exit
PB: predicated region body
PF: predicated region fallthrough
CT: control target
= control target key end

     0   :  { %s930_s9 = smov 0   ;;  %s932_s10 = smov 0   ;;  %s1032_s0 = inlined_call_operand.vmem [shape: bf16[2,8,32], index: 0, kind: input, shape index: {}]   ;;  %s1033_s1 = inlined_call_operand.vmem [shape: bf16[2,8,64], index: 1, kind: input, shape index: {}]   ;;  %s1034_s2 = inlined_call_operand.vmem [shape: bf16[2,8,32], index: 2, kind: output, shape index: {}]  }
   0x1   :  { %s934_s11 = smov 0  }
   0x2 LB: > { %s24_s12 = sadd.s32 1, %s897_s10  ;;  %p746_p0 = scmp.ge.s32.totalorder %s901_s11, 1  ;;  %s901_s11 = sphi %s934_s11, %s12_s11   ;;  %s897_s10 = sphi %s932_s10, %s1036_s10   ;;  %s893_s9 = sphi %s930_s9, %s1035_s9  }
   0x3   : > { %p26_p1 = scmp.ge.s32.totalorder %s24_s12, 2  ;;  %p139_p2 = scmp.lt.s32.totalorder %s901_s11, 3 }
   0x5   : > { %s1038_s12 = smov (%p26_p1, %s24_s12), 0  ;;  %p140_p3 = pnand %p746_p0, %p139_p2 }
   0x6   : > { %p169_p4 = scmp.lt.s32.totalorder (!%p140_p3), %s893_s9, 1  ;;  %v903_v0 = vmov (!%p140_p3), 0.0   ;;  %vm904_vm0 = vmmov (!%p140_p3), 0   ;;  %vm192_vm1 = vcmask (!%p140_p3), 64512   ;;  %s905_s20 = smov (!%p140_p3), 96   ;;  %vm259_vm2 = vcmask (!%p140_p3), 1043456  }
   0x7   : > { %143 = sbr.rel (%p140_p3) target bundleno = 1438 (0x59e), region = 28  ;;  %778 = vmatprep.subr.bf16.mxu0 (!%p140_p3), %v903_v0  ;;  %780 = vmatprep.mubr.msk.bf16.mxu0 (!%p140_p3), %vm904_vm0, %v903_v0  ;;  %s906_s21 = smov (!%p140_p3), 120   ;;  %vm649_vm3 = vcmask (!%p140_p3), 130048   ;;  %vm651_vm4 = vcmask (!%p140_p3), 195584   ;;  %vm654_vm5 = vcmask (!%p140_p3), 257024  }
   0x8   : > { %784 = vmatprep.subr.bf16.mxu1 (!%p140_p3), %v903_v0  ;;  %786 = vmatprep.mubr.msk.bf16.mxu1 (!%p140_p3), %vm904_vm0, %v903_v0  ;;  %s907_s22 = smov (!%p140_p3), 112   ;;  %s908_s23 = smov (!%p140_p3), 104  }
   0x9   : > { %s909_s24 = smov (!%p140_p3), 88   ;;  %s910_s25 = smov (!%p140_p3), 72  }
   0xa   : > { %s911_s26 = smov (!%p140_p3), 80   ;;  %s912_s27 = smov (!%p140_p3), 8  }
   0xb   : > { %s913_s28 = smov (!%p140_p3), 16   ;;  %s914_s29 = smov (!%p140_p3), 24  }
   0xe   : > { %s1040_s9 = smov (!%p169_p4, %s893_s9), 1 }
   0xf   : > { %s954_s13 = sshll.u32 %s1040_s9, 2 }
  0x10   : > { %s175_s16 = scalar_lea.vmem %s1032_s0, %s954_s13  ;;  %s179_s19 = scalar_lea.vmem %s1033_s1, %s954_s13 }
  0x11   : > { %v190_v1 = vld [vmem:[%s179_s19] sm:$0xf]  ;;  %s186_s4 = scalar_lea.vmem %s1034_s2, %s954_s13 }
  0x12   : > { %v197_v2 = vsel %vm192_vm1, %v190_v1, 0  ;;  %v189_v3 = vld [vmem:[%s175_s16] sm:$0xf]  ;;  %v970_v10 = vcombine.low %v190_v1, %v190_v1 }
  0x13   : > { %779 = vmatpush3.bf16.xpose.msra.mxu0 %v197_v2  ;;  %v191_v4 = vmul.bf16 1052065461, %v189_v3 }
  0x14   : > { %796 = vmatprep.subr.bf16.mxu0 %v903_v0  ;;  %254 = vrot.lane.b32.xlu1 %v970_v10, %s905_s20 }
  0x15   : > { %v753_v11 = vcombine.low %v191_v4, %v191_v4 }
  0x18   : > { %308 = vrot.lane.b32.xlu1 %v970_v10, %s906_s21 }
  0x1a   : > { %781 = vmatmul.mubr.msk.bf16.vlgmr.msra.gmra.mrb[0].mxu0 %vm192_vm1, %v191_v4 }
  0x1b   : > { %798 = vmatprep.mubr.msk.bf16.mxu0 %vm904_vm0, %v903_v0 }
  0x1c   : > { %418 = vrot.lane.b32.xlu1 %v970_v10, %s907_s22 }
  0x20   : > { %416 = vrot.lane.b32.xlu1 %v753_v11, %s907_s22 }
  0x24   : > { %528 = vrot.lane.b32.xlu1 %v970_v10, %s908_s23 }
  0x28   : > { %526 = vrot.lane.b32.xlu1 %v753_v11, %s908_s23 }
  0x86   : > { %v255_v17 = vpop.permute.xlu1 %254 }
  0x87   : > { %v261_v18 = vsel %vm259_vm2, %v255_v17, 0 }
  0x88   : > { %785 = vmatpush3.bf16.msra.mxu1 %v261_v18 }
  0x89   : > { %790 = vmatprep.subr.bf16.mxu1 %v903_v0 }
  0x8a   : > { %v309_v21 = vpop.permute.xlu1 %308 }
  0x8b   : > { %v314_v23 = vsel %vm192_vm1, %v309_v21, 0 }
  0x8e   : > { %v419_v25 = vpop.permute.xlu1 %418 }
  0x8f   : > { %v424_v28 = vsel %vm192_vm1, %v419_v25, 0 }
  0x92   : > { %v417_v27 = vpop.permute.xlu1 %416 }
  0x96   : > { %v529_v29 = vpop.permute.xlu1 %528 }
  0x97   : > { %v534_v30 = vsel %vm192_vm1, %v529_v29, 0 }
  0x9a   : > { %v527_v31 = vpop.permute.xlu1 %526 }
  0xed   : > { %v233_v5 = vpop.f32.mrb[0].mxu0 }
  0xee   : > { %v782_v6 = vpop.f32.mrb[1].mxu0  ;;  %v239_v7 = vsel %vm192_vm1, %v233_v5, -inf }
  0xef   : > { %240 = vmax.xlane.f32.xlu0 %v239_v7  ;;  %v236_v8 = vpop.f32.mrb[2].mxu0 }
  0xf0   : > { %v783_v9 = vpop.f32.mrb[3].mxu0 }
 0x17c   : > { %v241_v12 = vpop.xlane.xlu0 %240 }
 0x17d   : > { %v242_v13 = vsub.f32 %v233_v5, %v241_v12 }
 0x17f   : > { %v243_v14 = vmul.f32 1.442695, %v242_v13 }
 0x181   : > { %863 = vpow2.f32 %v243_v14 }
 0x18b   : > { %v864_v15 = vpop.eup %863 }
 0x18c   : > { %v245_v16 = vsel %vm192_vm1, %v864_v15, 0.0 }
 0x18d   : > { %246 = vadd.xlane.f32.xlu0 %v245_v16 }
 0x1a3   : > { %306 = vrot.lane.b32.xlu0 %v753_v11, %s906_s21 }
 0x21a   : > { %v247_v19 = vpop.xlane.xlu0 %246 }
 0x21b   : > { %865 = vrcp.f32 %v247_v19 }
 0x21e   : > { %v307_v26 = vpop.permute.xlu0 %306 }
 0x225   : > { %v866_v20 = vpop.eup %865 }
 0x226   : > { %v249_v22 = vmul.f32 %v866_v20, %v864_v15 }
 0x228   : > { %v250_v24 = vpack.c.bf16 %v249_v22, %v249_v22 }
 0x22a   : > { %787 = vmatmul.mubr.msk.bf16.vlgmr.msra.gmra.mrb[0].mxu1 %vm192_vm1, %v250_v24 }
 0x22b   : > { %791 = vmatpush3.bf16.xpose.msra.mxu1 %v314_v23  ;;  %792 = vmatprep.mubr.msk.bf16.mxu1 %vm904_vm0, %v903_v0 }
 0x22c   : > { %802 = vmatprep.subr.bf16.mxu1 %v903_v0 }
 0x232   : > { %793 = vmatmul.mubr.msk.bf16.vlgmr.msra.gmra.mrb[4].mxu1 %vm192_vm1, %v307_v26 }
 0x233   : > { %803 = vmatpush3.bf16.xpose.msra.mxu1 %v424_v28  ;;  %804 = vmatprep.mubr.msk.bf16.mxu1 %vm904_vm0, %v903_v0 }
 0x234   : > { %814 = vmatprep.subr.bf16.mxu1 %v903_v0 }
 0x23a   : > { %805 = vmatmul.mubr.msk.bf16.vlgmr.msra.gmra.mrb[8].mxu1 %vm192_vm1, %v417_v27 }
 0x23b   : > { %815 = vmatpush3.bf16.xpose.msra.mxu1 %v534_v30  ;;  %816 = vmatprep.mubr.msk.bf16.mxu1 %vm904_vm0, %v903_v0 }
 0x242   : > { %817 = vmatmul.mubr.msk.bf16.vlgmr.msra.gmra.mrb[12].mxu1 %vm192_vm1, %v527_v31 }
 0x2fd   : > { %v994_v32 = vpop.f32.mrb[0].mxu1 }
 0x2fe   : > { %v788_v33 = vpop.f32.mrb[1].mxu1 }
 0x2ff   : > { %v300_v34 = vpop.f32.mrb[2].mxu1 }
 0x300   : > { %v789_v35 = vpop.f32.mrb[3].mxu1 }
 0x305   : > { %v350_v36 = vpop.f32.mrb[4].mxu1 }
 0x306   : > { %v794_v37 = vpop.f32.mrb[5].mxu1  ;;  %v356_v38 = vsel %vm192_vm1, %v350_v36, -inf }
 0x307   : > { %357 = vmax.xlane.f32.xlu1 %v356_v38  ;;  %v353_v39 = vpop.f32.mrb[6].mxu1 }
 0x308   : > { %v795_v40 = vpop.f32.mrb[7].mxu1 }
 0x30d   : > { %v460_v41 = vpop.f32.mrb[8].mxu1 }
 0x30e   : > { %v806_v42 = vpop.f32.mrb[9].mxu1  ;;  %v466_v43 = vsel %vm192_vm1, %v460_v41, -inf }
 0x30f   : > { %467 = vmax.xlane.f32.xlu0 %v466_v43  ;;  %v463_v44 = vpop.f32.mrb[10].mxu1 }
 0x310   : > { %v807_v45 = vpop.f32.mrb[11].mxu1 }
 0x315   : > { %v570_v46 = vpop.f32.mrb[12].mxu1 }
 0x316   : > { %v818_v47 = vpop.f32.mrb[13].mxu1  ;;  %v576_v48 = vsel %vm192_vm1, %v570_v46, -inf }
 0x317   : > { %577 = vmax.xlane.f32.xlu1 %v576_v48  ;;  %v573_v49 = vpop.f32.mrb[14].mxu1 }
 0x318   : > { %v819_v50 = vpop.f32.mrb[15].mxu1 }
 0x328   : > { %368 = vrot.lane.b32.xlu1 %v970_v10, %s909_s24 }
 0x394   : > { %v358_v51 = vpop.xlane.xlu1 %357 }
 0x395   : > { %v359_v52 = vsub.f32 %v350_v36, %v358_v51 }
 0x397   : > { %v360_v53 = vmul.f32 1.442695, %v359_v52 }
 0x399   : > { %867 = vpow2.f32 %v360_v53 }
 0x39c   : > { %v468_v54 = vpop.xlane.xlu0 %467 }
 0x39d   : > { %v469_v55 = vsub.f32 %v460_v41, %v468_v54 }
 0x39f   : > { %v470_v56 = vmul.f32 1.442695, %v469_v55 }
 0x3a1   : > { %869 = vpow2.f32 %v470_v56 }
 0x3a3   : > { %v868_v57 = vpop.eup %867 }
 0x3a4   : > { %v578_v58 = vpop.xlane.xlu1 %577  ;;  %v362_v59 = vsel %vm192_vm1, %v868_v57, 0.0 }
 0x3a5   : > { %v579_v60 = vsub.f32 %v570_v46, %v578_v58  ;;  %363 = vadd.xlane.f32.xlu0 %v362_v59 }
 0x3a7   : > { %v580_v61 = vmul.f32 1.442695, %v579_v60 }
 0x3a8   : > { %v369_v62 = vpop.permute.xlu1 %368 }
 0x3a9   : > { %871 = vpow2.f32 %v580_v61  ;;  %v374_v63 = vsel %vm259_vm2, %v369_v62, 0 }
 0x3aa   : > { %797 = vmatpush3.bf16.msra.mxu0 %v374_v63 }
 0x3ab   : > { %v870_v1 = vpop.eup %869  ;;  %808 = vmatprep.subr.bf16.mxu0 %v903_v0 }
 0x3ac   : > { %v472_v2 = vsel %vm192_vm1, %v870_v1, 0.0 }
 0x3ad   : > { %473 = vadd.xlane.f32.xlu1 %v472_v2 }
 0x3b3   : > { %v872_v3 = vpop.eup %871 }
 0x3b4   : > { %v582_v4 = vsel %vm192_vm1, %v872_v3, 0.0 }
 0x3b5   : > { %583 = vadd.xlane.f32.xlu0 %v582_v4 }
 0x3be   : > { %588 = vrot.lane.b32.xlu1 %v970_v10, %s910_s25 }
 0x3cb   : > { %478 = vrot.lane.b32.xlu0 %v970_v10, %s911_s26 }
 0x432   : > { %v364_v5 = vpop.xlane.xlu0 %363 }
 0x433   : > { %873 = vrcp.f32 %v364_v5 }
 0x43a   : > { %v474_v6 = vpop.xlane.xlu1 %473 }
 0x43b   : > { %875 = vrcp.f32 %v474_v6 }
 0x43d   : > { %v874_v7 = vpop.eup %873 }
 0x43e   : > { %v366_v8 = vmul.f32 %v874_v7, %v868_v57  ;;  %v589_v15 = vpop.permute.xlu1 %588 }
 0x43f   : > { %v594_v17 = vsel %vm259_vm2, %v589_v15, 0 }
 0x440   : > { %v367_v9 = vpack.c.bf16 %v366_v8, %v366_v8 }
 0x442   : > { %v584_v11 = vpop.xlane.xlu0 %583  ;;  %799 = vmatmul.mubr.msk.bf16.vlgmr.msra.gmra.mrb[4].mxu0 %vm192_vm1, %v367_v9 }
 0x443   : > { %877 = vrcp.f32 %v584_v11  ;;  %810 = vmatprep.mubr.msk.bf16.mxu0 %vm904_vm0, %v903_v0 }
 0x445   : > { %v876_v12 = vpop.eup %875 }
 0x446   : > { %v476_v13 = vmul.f32 %v876_v12, %v870_v1  ;;  %v479_v14 = vpop.permute.xlu0 %478 }
 0x447   : > { %v484_v10 = vsel %vm259_vm2, %v479_v14, 0 }
 0x448   : > { %809 = vmatpush3.bf16.msra.mxu0 %v484_v10  ;;  %v477_v16 = vpack.c.bf16 %v476_v13, %v476_v13 }
 0x449   : > { %820 = vmatprep.subr.bf16.mxu0 %v903_v0 }
 0x44b   : > { %811 = vmatmul.mubr.msk.bf16.vlgmr.msra.gmra.mrb[8].mxu0 %vm192_vm1, %v477_v16 }
 0x44c   : > { %821 = vmatpush3.bf16.msra.mxu0 %v594_v17  ;;  %822 = vmatprep.mubr.msk.bf16.mxu0 %vm904_vm0, %v903_v0 }
 0x44d   : > { %v878_v18 = vpop.eup %877 }
 0x44e   : > { %v586_v19 = vmul.f32 %v878_v18, %v872_v3 }
 0x450   : > { %v587_v20 = vpack.c.bf16 %v586_v19, %v586_v19 }
 0x453   : > { %823 = vmatmul.mubr.msk.bf16.vlgmr.msra.gmra.mrb[12].mxu0 %vm192_vm1, %v587_v20 }
 0x515   : > { %v410_v21 = vpop.f32.mrb[4].mxu0 }
 0x516   : > { %637 = vrot.lane.b32.xlu1 %v410_v21, %s912_s27  ;;  %v800_v22 = vpop.f32.mrb[5].mxu0 }
 0x517   : > { %v413_v23 = vpop.f32.mrb[6].mxu0 }
 0x518   : > { %v801_v24 = vpop.f32.mrb[7].mxu0 }
 0x51e   : > { %v520_v25 = vpop.f32.mrb[8].mxu0 }
 0x51f   : > { %641 = vrot.lane.b32.xlu0 %v520_v25, %s913_s28  ;;  %v812_v26 = vpop.f32.mrb[9].mxu0 }
 0x520   : > { %v523_v27 = vpop.f32.mrb[10].mxu0 }
 0x521   : > { %v813_v28 = vpop.f32.mrb[11].mxu0 }
 0x526   : > { %v630_v29 = vpop.f32.mrb[12].mxu0 }
 0x527   : > { %645 = vrot.lane.b32.xlu1 %v630_v29, %s914_s29  ;;  %v824_v0 = vpop.f32.mrb[13].mxu0 }
 0x528   : > { %v633_v30 = vpop.f32.mrb[14].mxu0 }
 0x529   : > { %v825_v31 = vpop.f32.mrb[15].mxu0 }
 0x588   : > { %v638_v33 = vpop.permute.xlu1 %637 }
 0x589   : > { %v648_v35 = vsel %vm192_vm1, %v994_v32, %v638_v33 }
 0x591   : > { %v642_v34 = vpop.permute.xlu0 %641 }
 0x592   : > { %v650_v36 = vsel %vm649_vm3, %v648_v35, %v642_v34 }
 0x599   : > { %v646_v37 = vpop.permute.xlu1 %645 }
 0x59a   : > { %v652_v38 = vsel %vm651_vm4, %v650_v36, %v646_v37 }
 0x59b   : > { %v653_v39 = vpack.c.bf16 %v652_v38, %v652_v38 }
 0x59d   : > { %655 = vst.msk [vmem:[%s186_s4] sm:$0xf] %vm654_vm5, %v653_v39 }
 0x59e PF: > { %s12_s11 = sadd.s32 1, %s901_s11   ;;  %s1035_s9 = smov %s897_s10 }
 0x59f   : > { %p9_p5 = scmp.ge.s32.totalorder %s12_s11, 4   ;;  %s1036_s10 = smov %s1038_s12 }
 0x5a1   :  { %11 = sbr.rel (!%p9_p5) target bundleno = 2 (0x2), region = 61 }

// kernel: run.34
= control target key start
LH: loop header
LB: loop body
LE: loop exit
PB: predicated region body
PF: predicated region fallthrough
CT: control target
= control target key end

     0   :  { %s1007_s12 = smov 0   ;;  %s1009_s13 = smov 0   ;;  %s1119_s0 = inlined_call_operand.vmem [shape: bf16[2,8,96], index: 0, kind: input, shape index: {}, may-alias: {0,1}]   ;;  %s1120_s1 = inlined_call_operand.vmem [shape: bf16[2,8,96], index: 1, kind: input, shape index: {}, may-alias: {0,1}]   ;;  %s1121_s2 = inlined_call_operand.vmem [shape: f32[8,8], index: 2, kind: input, shape index: {}]   ;;  %s1122_s3 = inlined_call_operand.vmem [shape: bf16[2,8,32], index: 3, kind: output, shape index: {}]  }
   0x1   :  { %s1011_s14 = smov 0  }
   0x2 LB: > { %s25_s15 = sadd.s32 1, %s965_s13  ;;  %p810_p0 = scmp.ge.s32.totalorder %s969_s14, 1  ;;  %s969_s14 = sphi %s1011_s14, %s13_s14   ;;  %s965_s13 = sphi %s1009_s13, %s1124_s13   ;;  %s961_s12 = sphi %s1007_s12, %s1123_s12  }
   0x3   : > { %p27_p1 = scmp.ge.s32.totalorder %s25_s15, 2  ;;  %p173_p2 = scmp.lt.s32.totalorder %s969_s14, 3 }
   0x5   : > { %s1126_s15 = smov (%p27_p1, %s25_s15), 0  ;;  %p174_p3 = pnand %p810_p0, %p173_p2 }
   0x6   : > { %p209_p4 = scmp.lt.s32.totalorder (!%p174_p3), %s961_s12, 1  ;;  %v971_v0 = vmov (!%p174_p3), 0.0   ;;  %vm972_vm0 = vmmov (!%p174_p3), 0   ;;  %s973_s20 = smov (!%p174_p3), 96   ;;  %vm242_vm1 = vcmask (!%p174_p3), 64512   ;;  %v1054_v6 = vld [vmem:[%s1121_s2] sm:$0xff] (!%p174_p3) }
   0x7   : > { %177 = sbr.rel (%p174_p3) target bundleno = 1601 (0x641), region = 32  ;;  %842 = vmatprep.subr.bf16.mxu0 (!%p174_p3), %v971_v0  ;;  %844 = vmatprep.mubr.msk.bf16.mxu0 (!%p174_p3), %vm972_vm0, %v971_v0  ;;  %s974_s24 = smov (!%p174_p3), 64   ;;  %vm306_vm2 = vcmask (!%p174_p3), 1043456   ;;  %vm696_vm3 = vcmask (!%p174_p3), 130048   ;;  %vm698_vm4 = vcmask (!%p174_p3), 195584   ;;  %vm701_vm5 = vcmask (!%p174_p3), 257024  }
   0x8   : > { %848 = vmatprep.subr.bf16.mxu1 (!%p174_p3), %v971_v0  ;;  %850 = vmatprep.mubr.msk.bf16.mxu1 (!%p174_p3), %vm972_vm0, %v971_v0  ;;  %s975_s25 = smov (!%p174_p3), 88   ;;  %s976_s28 = smov (!%p174_p3), 72  }
   0x9   : > { %s977_s29 = smov (!%p174_p3), 120   ;;  %s978_s30 = smov (!%p174_p3), 80  }
   0xa   : > { %s979_s4 = smov (!%p174_p3), 112   ;;  %s980_s5 = smov (!%p174_p3), 104  }
   0xb   : > { %s981_s6 = smov (!%p174_p3), 56   ;;  %s982_s7 = smov (!%p174_p3), 48  }
   0xc   : > { %s983_s8 = smov (!%p174_p3), 40   ;;  %s984_s9 = smov (!%p174_p3), 8  }
   0xd   : > { %s985_s10 = smov (!%p174_p3), 16   ;;  %s986_s11 = smov (!%p174_p3), 24  }
   0xe   : > { %s1128_s12 = smov (!%p209_p4, %s961_s12), 1 }
   0xf   : > { %s1031_s16 = sshll.u32 %s1128_s12, 2 }
  0x10   : > { %s219_s19 = scalar_lea.vmem %s1120_s1, %s1031_s16  ;;  %s215_s23 = scalar_lea.vmem %s1119_s0, %s1031_s16 }
  0x11   : > { %v1037_v1 = vld [vmem:[%s219_s19] ss:$0 sps:$4 sm:$0xff]   ;;  %s230_s18 = scalar_lea.vmem %s1122_s3, %s1031_s16 }
  0x12   : > { %240 = vrot.lane.b32.xlu0 %v1037_v1, %s973_s20  ;;  %v234_v4 = vld [vmem:[%s215_s23] sm:$0xf]  ;;  %301 = vrot.lane.b32.xlu1 %v1037_v1, %s974_s24 }
  0x13   : > { %v236_v5 = vmul.bf16 1052065461, %v234_v4 }
  0x15   : > { %v817_v20 = vcombine.low %v236_v5, %v236_v5 }
  0x16   : > { %355 = vrot.lane.b32.xlu1 %v1037_v1, %s975_s25 }
  0x84   : > { %v241_v2 = vpop.permute.xlu0 %240  ;;  %v302_v13 = vpop.permute.xlu1 %301 }
  0x85   : > { %v247_v3 = vsel %vm242_vm1, %v241_v2, 0  ;;  %v308_v14 = vsel %vm306_vm2, %v302_v13, 0 }
  0x86   : > { %843 = vmatpush3.bf16.xpose.msra.mxu0 %v247_v3  ;;  %849 = vmatpush3.bf16.msra.mxu1 %v308_v14 }
  0x87   : > { %860 = vmatprep.subr.bf16.mxu0 %v971_v0  ;;  %854 = vmatprep.subr.bf16.mxu1 %v971_v0 }
  0x88   : > { %v356_v21 = vpop.permute.xlu1 %355 }
  0x89   : > { %v361_v27 = vsel %vm242_vm1, %v356_v21, 0 }
  0x8d   : > { %845 = vmatmul.mubr.msk.bf16.vlgmr.msra.gmra.mrb[0].mxu0 %vm242_vm1, %v236_v5 }
  0x8e   : > { %862 = vmatprep.mubr.msk.bf16.mxu0 %vm972_vm0, %v971_v0 }
 0x160   : > { %v283_v7 = vpop.f32.mrb[0].mxu0 }
 0x161   : > { %v284_v8 = vadd.f32 %v283_v7, %v1054_v6  ;;  %v846_v9 = vpop.f32.mrb[1].mxu0 }
 0x162   : > { %v286_v10 = vpop.f32.mrb[2].mxu0 }
 0x163   : > { %v847_v11 = vpop.f32.mrb[3].mxu0  ;;  %v289_v12 = vsel %vm242_vm1, %v284_v8, -inf }
 0x164   : > { %290 = vmax.xlane.f32.xlu0 %v289_v12 }
 0x17a   : > { %575 = vrot.lane.b32.xlu0 %v1037_v1, %s976_s28 }
 0x1f1   : > { %v291_v15 = vpop.xlane.xlu0 %290 }
 0x1f2   : > { %v292_v16 = vsub.f32 %v284_v8, %v291_v15 }
 0x1f4   : > { %v293_v17 = vmul.f32 1.442695, %v292_v16 }
 0x1f5   : > { %v576_v30 = vpop.permute.xlu0 %575 }
 0x1f6   : > { %931 = vpow2.f32 %v293_v17  ;;  %v581_v32 = vsel %vm242_vm1, %v576_v30, 0 }
 0x200   : > { %v932_v18 = vpop.eup %931 }
 0x201   : > { %v295_v19 = vsel %vm242_vm1, %v932_v18, 0.0 }
 0x202   : > { %296 = vadd.xlane.f32.xlu1 %v295_v19 }
 0x213   : > { %353 = vrot.lane.b32.xlu1 %v817_v20, %s977_s29 }
 0x217   : > { %465 = vrot.lane.b32.xlu1 %v1037_v1, %s978_s30 }
 0x21b   : > { %463 = vrot.lane.b32.xlu1 %v817_v20, %s979_s4 }
 0x21f   : > { %573 = vrot.lane.b32.xlu1 %v817_v20, %s980_s5 }
 0x28f   : > { %v297_v22 = vpop.xlane.xlu1 %296 }
 0x290   : > { %933 = vrcp.f32 %v297_v22 }
 0x293   : > { %v354_v25 = vpop.permute.xlu1 %353 }
 0x297   : > { %v466_v28 = vpop.permute.xlu1 %465 }
 0x298   : > { %v471_v29 = vsel %vm242_vm1, %v466_v28, 0 }
 0x29a   : > { %v934_v23 = vpop.eup %933 }
 0x29b   : > { %v299_v24 = vmul.f32 %v934_v23, %v932_v18  ;;  %v464_v31 = vpop.permute.xlu1 %463 }
 0x29d   : > { %v300_v26 = vpack.c.bf16 %v299_v24, %v299_v24 }
 0x29f   : > { %851 = vmatmul.mubr.msk.bf16.vlgmr.msra.gmra.mrb[0].mxu1 %vm242_vm1, %v300_v26  ;;  %v574_v33 = vpop.permute.xlu1 %573 }
 0x2a0   : > { %855 = vmatpush3.bf16.xpose.msra.mxu1 %v361_v27  ;;  %856 = vmatprep.mubr.msk.bf16.mxu1 %vm972_vm0, %v971_v0 }
 0x2a1   : > { %866 = vmatprep.subr.bf16.mxu1 %v971_v0 }
 0x2a7   : > { %857 = vmatmul.mubr.msk.bf16.vlgmr.msra.gmra.mrb[4].mxu1 %vm242_vm1, %v354_v25 }
 0x2a8   : > { %867 = vmatpush3.bf16.xpose.msra.mxu1 %v471_v29  ;;  %868 = vmatprep.mubr.msk.bf16.mxu1 %vm972_vm0, %v971_v0 }
 0x2a9   : > { %878 = vmatprep.subr.bf16.mxu1 %v971_v0 }
 0x2af   : > { %869 = vmatmul.mubr.msk.bf16.vlgmr.msra.gmra.mrb[8].mxu1 %vm242_vm1, %v464_v31 }
 0x2b0   : > { %879 = vmatpush3.bf16.xpose.msra.mxu1 %v581_v32  ;;  %880 = vmatprep.mubr.msk.bf16.mxu1 %vm972_vm0, %v971_v0 }
 0x2b7   : > { %881 = vmatmul.mubr.msk.bf16.vlgmr.msra.gmra.mrb[12].mxu1 %vm242_vm1, %v574_v33 }
 0x372   : > { %v1078_v34 = vpop.f32.mrb[0].mxu1 }
 0x373   : > { %v852_v35 = vpop.f32.mrb[1].mxu1 }
 0x374   : > { %v347_v36 = vpop.f32.mrb[2].mxu1 }
 0x375   : > { %v853_v37 = vpop.f32.mrb[3].mxu1 }
 0x37a   : > { %v397_v38 = vpop.f32.mrb[4].mxu1 }
 0x37b   : > { %v398_v39 = vadd.f32 %v397_v38, %v1054_v6  ;;  %v858_v40 = vpop.f32.mrb[5].mxu1 }
 0x37c   : > { %v400_v41 = vpop.f32.mrb[6].mxu1 }
 0x37d   : > { %v859_v42 = vpop.f32.mrb[7].mxu1  ;;  %v403_v43 = vsel %vm242_vm1, %v398_v39, -inf }
 0x37e   : > { %404 = vmax.xlane.f32.xlu1 %v403_v43 }
 0x382   : > { %v507_v44 = vpop.f32.mrb[8].mxu1 }
 0x383   : > { %v508_v45 = vadd.f32 %v507_v44, %v1054_v6  ;;  %v870_v46 = vpop.f32.mrb[9].mxu1 }
 0x384   : > { %v510_v47 = vpop.f32.mrb[10].mxu1 }
 0x385   : > { %v513_v48 = vsel %vm242_vm1, %v508_v45, -inf  ;;  %v871_v49 = vpop.f32.mrb[11].mxu1 }
 0x386   : > { %514 = vmax.xlane.f32.xlu0 %v513_v48 }
 0x38a   : > { %v617_v50 = vpop.f32.mrb[12].mxu1 }
 0x38b   : > { %v618_v51 = vadd.f32 %v617_v50, %v1054_v6  ;;  %v882_v52 = vpop.f32.mrb[13].mxu1 }
 0x38c   : > { %v620_v53 = vpop.f32.mrb[14].mxu1 }
 0x38d   : > { %v623_v54 = vsel %vm242_vm1, %v618_v51, -inf  ;;  %v883_v55 = vpop.f32.mrb[15].mxu1 }
 0x38e   : > { %624 = vmax.xlane.f32.xlu1 %v623_v54 }
 0x40b   : > { %v405_v56 = vpop.xlane.xlu1 %404 }
 0x40c   : > { %v406_v57 = vsub.f32 %v398_v39, %v405_v56 }
 0x40e   : > { %v407_v58 = vmul.f32 1.442695, %v406_v57 }
 0x410   : > { %935 = vpow2.f32 %v407_v58 }
 0x413   : > { %v515_v4 = vpop.xlane.xlu0 %514 }
 0x414   : > { %v516_v5 = vsub.f32 %v508_v45, %v515_v4 }
 0x416   : > { %v517_v6 = vmul.f32 1.442695, %v516_v5 }
 0x41a   : > { %v936_v59 = vpop.eup %935 }
 0x41b   : > { %v625_v60 = vpop.xlane.xlu1 %624  ;;  %v409_v61 = vsel %vm242_vm1, %v936_v59, 0.0 }
 0x41c   : > { %v626_v62 = vsub.f32 %v618_v51, %v625_v60  ;;  %410 = vadd.xlane.f32.xlu1 %v409_v61 }
 0x41e   : > { %v627_v63 = vmul.f32 1.442695, %v626_v62 }
 0x420   : > { %937 = vpow2.f32 %v627_v63 }
 0x421   : > { %939 = vpow2.f32 %v517_v6 }
 0x42a   : > { %v938_v2 = vpop.eup %937 }
 0x42b   : > { %v629_v3 = vsel %vm242_vm1, %v938_v2, 0.0  ;;  %v940_v7 = vpop.eup %939 }
 0x42c   : > { %630 = vadd.xlane.f32.xlu0 %v629_v3  ;;  %v519_v8 = vsel %vm242_vm1, %v940_v7, 0.0 }
 0x42d   : > { %415 = vrot.lane.b32.xlu1 %v1037_v1, %s981_s6 }
 0x442   : > { %525 = vrot.lane.b32.xlu0 %v1037_v1, %s982_s7 }
 0x451   : > { %520 = vadd.xlane.f32.xlu1 %v519_v8 }
 0x462   : > { %635 = vrot.lane.b32.xlu1 %v1037_v1, %s983_s8 }
 0x4a9   : > { %v411_v9 = vpop.xlane.xlu1 %410 }
 0x4aa   : > { %941 = vrcp.f32 %v411_v9 }
 0x4ad   : > { %v416_v10 = vpop.permute.xlu1 %415 }
 0x4ae   : > { %v421_v11 = vsel %vm306_vm2, %v416_v10, 0 }
 0x4af   : > { %861 = vmatpush3.bf16.msra.mxu0 %v421_v11 }
 0x4b0   : > { %872 = vmatprep.subr.bf16.mxu0 %v971_v0 }
 0x4b4   : > { %v942_v12 = vpop.eup %941 }
 0x4b5   : > { %v413_v13 = vmul.f32 %v942_v12, %v936_v59 }
 0x4b7   : > { %v414_v14 = vpack.c.bf16 %v413_v13, %v413_v13 }
 0x4b9   : > { %863 = vmatmul.mubr.msk.bf16.vlgmr.msra.gmra.mrb[4].mxu0 %vm242_vm1, %v414_v14  ;;  %v631_v15 = vpop.xlane.xlu0 %630 }
 0x4ba   : > { %874 = vmatprep.mubr.msk.bf16.mxu0 %vm972_vm0, %v971_v0 }
 0x4bd   : > { %v526_v16 = vpop.permute.xlu0 %525 }
 0x4be   : > { %v531_v1 = vsel %vm306_vm2, %v526_v16, 0 }
 0x4bf   : > { %873 = vmatpush3.bf16.msra.mxu0 %v531_v1 }
 0x4c0   : > { %884 = vmatprep.subr.bf16.mxu0 %v971_v0 }
 0x4de   : > { %v521_v17 = vpop.xlane.xlu1 %520 }
 0x4df   : > { %943 = vrcp.f32 %v521_v17 }
 0x4e0   : > { %945 = vrcp.f32 %v631_v15 }
 0x4e2   : > { %v636_v19 = vpop.permute.xlu1 %635 }
 0x4e3   : > { %v641_v21 = vsel %vm306_vm2, %v636_v19, 0 }
 0x4e9   : > { %v944_v18 = vpop.eup %943 }
 0x4ea   : > { %v523_v20 = vmul.f32 %v944_v18, %v940_v7  ;;  %v946_v23 = vpop.eup %945 }
 0x4eb   : > { %v633_v24 = vmul.f32 %v946_v23, %v938_v2 }
 0x4ec   : > { %v524_v22 = vpack.c.bf16 %v523_v20, %v523_v20 }
 0x4ed   : > { %v634_v25 = vpack.c.bf16 %v633_v24, %v633_v24 }
 0x4ee   : > { %875 = vmatmul.mubr.msk.bf16.vlgmr.msra.gmra.mrb[8].mxu0 %vm242_vm1, %v524_v22 }
 0x4ef   : > { %885 = vmatpush3.bf16.msra.mxu0 %v641_v21  ;;  %886 = vmatprep.mubr.msk.bf16.mxu0 %vm972_vm0, %v971_v0 }
 0x4f6   : > { %887 = vmatmul.mubr.msk.bf16.vlgmr.msra.gmra.mrb[12].mxu0 %vm242_vm1, %v634_v25 }
 0x58c   : > { %v457_v26 = vpop.f32.mrb[4].mxu0 }
 0x58d   : > { %684 = vrot.lane.b32.xlu1 %v457_v26, %s984_s9  ;;  %v864_v27 = vpop.f32.mrb[5].mxu0 }
 0x58e   : > { %v460_v28 = vpop.f32.mrb[6].mxu0 }
 0x58f   : > { %v865_v29 = vpop.f32.mrb[7].mxu0 }
 0x5c1   : > { %v567_v30 = vpop.f32.mrb[8].mxu0 }
 0x5c2   : > { %688 = vrot.lane.b32.xlu0 %v567_v30, %s985_s10  ;;  %v876_v31 = vpop.f32.mrb[9].mxu0 }
 0x5c3   : > { %v570_v32 = vpop.f32.mrb[10].mxu0 }
 0x5c4   : > { %v877_v33 = vpop.f32.mrb[11].mxu0 }
 0x5c9   : > { %v677_v35 = vpop.f32.mrb[12].mxu0 }
 0x5ca   : > { %692 = vrot.lane.b32.xlu1 %v677_v35, %s986_s11  ;;  %v888_v0 = vpop.f32.mrb[13].mxu0 }
 0x5cb   : > { %v680_v36 = vpop.f32.mrb[14].mxu0 }
 0x5cc   : > { %v889_v37 = vpop.f32.mrb[15].mxu0 }
 0x5ff   : > { %v685_v38 = vpop.permute.xlu1 %684 }
 0x600   : > { %v695_v40 = vsel %vm242_vm1, %v1078_v34, %v685_v38 }
 0x634   : > { %v689_v39 = vpop.permute.xlu0 %688 }
 0x635   : > { %v697_v41 = vsel %vm696_vm3, %v695_v40, %v689_v39 }
 0x63c   : > { %v693_v42 = vpop.permute.xlu1 %692 }
 0x63d   : > { %v699_v43 = vsel %vm698_vm4, %v697_v41, %v693_v42 }
 0x63e   : > { %v700_v44 = vpack.c.bf16 %v699_v43, %v699_v43 }
 0x640   : > { %702 = vst.msk [vmem:[%s230_s18] sm:$0xf] %vm701_vm5, %v700_v44 }
 0x641 PF: > { %s13_s14 = sadd.s32 1, %s969_s14   ;;  %s1123_s12 = smov %s965_s13 }
 0x642   : > { %p10_p5 = scmp.ge.s32.totalorder %s13_s14, 4   ;;  %s1124_s13 = smov %s1126_s15 }
 0x644   :  { %12 = sbr.rel (!%p10_p5) target bundleno = 2 (0x2), region = 68 }

// kernel: run.49
= control target key start
LH: loop header
LB: loop body
LE: loop exit
PB: predicated region body
PF: predicated region fallthrough
CT: control target
= control target key end

     0   :  { %v190_v1 = vmov 0.0   ;;  %vm191_vm0 = vmmov 0   ;;  %s245_s0 = inlined_call_operand.vmem [shape: bf16[16,32], index: 0, kind: input, shape index: {}]   ;;  %s246_s1 = inlined_call_operand.vmem [shape: bf16[32,50], index: 1, kind: input, shape index: {}]   ;;  %s247_s2 = inlined_call_operand.vmem [shape: f32[1,50], index: 2, kind: input, shape index: {}]   ;;  %s248_s3 = inlined_call_operand.hbm [shape: f32[16,50], index: 3, kind: output, shape index: {}]  }
   0x1   :  { %v155_v0 = vld [vmem:[%s246_s1] sm:$0xff]   ;;  %142 = vmatprep.subr.bf16.mxu0 %v190_v1  ;;  %v156_v2 = vld [vmem:[%s246_s1 + $0x8] sm:$0xff]   ;;  %146 = vmatprep.mubr.msk.bf16.mxu0 %vm191_vm0, %v190_v1 }
   0x2   :  { %143 = vmatpush3.bf16.msra.mxu0 %v155_v0 }
   0x3   :  { %144 = vmatprep.subr.bf16.mxu0 %v190_v1 }
   0x4   :  { %8 = vsyncpa [#allocation3], 0  ;;  %v157_v3 = vld [vmem:[%s245_s0] sm:$0xff]   ;;  %vm46_vm1 = vcmask 261120   ;;  %vm91_vm2 = vcmask 408576   ;;  %s192_s0 = smov [#allocation2]  }
   0x5   :  { %v134_v4 = vld [vmem:[%s247_s2] ss:$0 sm:$0xff]  ;;  %s123_s1 = sshll.u32 %s192_s0, 4  ;;  %s124_s1 = int_to_ptr.vmem [resolvable:$true] %s123_s1 }
   0x6   :  { %145 = vmatpush3.bf16.msra.mxu0 %v156_v2  ;;  %s166_s2 = scalar_lea.vmem %s124_s1, 256  ;;  %p171_p1 = scmp.lt.s32.totalorder %s124_s1, %s124_s1 }
   0x7   :  { %p167_p0 = scmp.ne.s32.totalorder %s124_s1, %s166_s2  ;;  %p172_p2 = scmp.lt.s32.totalorder %s166_s2, %s166_s2 }
   0x9   :  { %147 = vmatmul.mubr.msk.bf16.vlgmr.msra.gmra.mrb[0].mxu0 %vm46_vm1, %v157_v3  ;;  %p173_p3 = por %p172_p2, %p171_p1 }
   0xb   :  { %p174_p4 = pnand %p173_p3, %p167_p0 }
  0xdc   :  { %v84_v5 = vpop.f32.mrb[0].mxu0 }
  0xdd   :  { %v85_v6 = vadd.f32 %v134_v4, %v84_v5  ;;  %v148_v7 = vpop.f32.mrb[1].mxu0 }
  0xde   :  { %v87_v8 = vpop.f32.mrb[2].mxu0 }
  0xdf   :  { %v88_v9 = vadd.f32 %v134_v4, %v87_v8  ;;  %v149_v10 = vpop.f32.mrb[3].mxu0  ;;  %v92_v11 = vsel %vm91_vm2, %v85_v6, -inf }
  0xe0   :  { %93 = vmax.xlane.f32.xlu0 %v92_v11 }
  0xe1   :  { %v95_v12 = vsel %vm91_vm2, %v88_v9, -inf }
  0xe4   :  { %96 = vmax.xlane.f32.xlu0 %v95_v12 }
 0x16d   :  { %v94_v13 = vpop.xlane.xlu0 %93 }
 0x16e   :  { %v98_v14 = vsub.f32 %v85_v6, %v94_v13 }
 0x170   :  { %v100_v15 = vmul.f32 1.442695, %v98_v14 }
 0x171   :  { %v97_v16 = vpop.xlane.xlu0 %96 }
 0x172   :  { %158 = vpow2.f32 %v100_v15  ;;  %v99_v17 = vsub.f32 %v88_v9, %v97_v16 }
 0x174   :  { %v102_v18 = vmul.f32 1.442695, %v99_v17 }
 0x176   :  { %160 = vpow2.f32 %v102_v18 }
 0x17c   :  { %v159_v19 = vpop.eup %158 }
 0x17d   :  { %v104_v20 = vsel %vm91_vm2, %v159_v19, 0.0 }
 0x17e   :  { %105 = vadd.xlane.f32.xlu1 %v104_v20 }
 0x180   :  { %v161_v21 = vpop.eup %160 }
 0x181   :  { %v107_v22 = vsel %vm91_vm2, %v161_v21, 0.0 }
 0x182   :  { %108 = vadd.xlane.f32.xlu1 %v107_v22 }
 0x20b   :  { %v106_v23 = vpop.xlane.xlu1 %105 }
 0x20c   :  { %162 = vlog2.f32 %v106_v23 }
 0x20f   :  { %v109_v24 = vpop.xlane.xlu1 %108 }
 0x210   :  { %164 = vlog2.f32 %v109_v24 }
 0x216   :  { %v163_v25 = vpop.eup %162 }
 0x217   :  { %v111_v26 = vmul.f32 0.6931472, %v163_v25 }
 0x219   :  { %v114_v27 = vsub.f32 %v98_v14, %v111_v26 }
 0x21a   :  { %v165_v28 = vpop.eup %164 }
 0x21b   :  { %116 = vst.msk [vmem:[#allocation2] sm:$0xff] %vm91_vm2, %v114_v27  ;;  %v113_v29 = vmul.f32 0.6931472, %v165_v28 }
 0x21d   :  { %v115_v30 = vsub.f32 %v99_v17, %v113_v29 }
 0x21f   :  { %117 = vst.msk [vmem:[#allocation2 + $0x8] sm:$0xff] %vm91_vm2, %v115_v30 }
 0x220   :  { %177 = shalt.err (!%p174_p4)
}
 0x221   :  { %s178_s22 = scalar_lea.hbm %s248_s3, 256 }
 0x222   :  { %p179_p5 = scmp.ne.s32.totalorder %s248_s3, %s178_s22  ;;  %p182_p6 = scmp.lt.u32.totalorder %s178_s22, %s248_s3 }
 0x224   :  { %p184_p7 = pnand %p182_p6, %p179_p5 }
 0x226   :  { %187 = shalt.err (!%p184_p7)
}
 0x227   :  { %s193_s27 = smov 128   ;;  %s194_s28 = smov 8  }
 0x228   :  { %129 = dma.vmem_to_hbm [thread:$0]  %s124_s1, 256, %s248_s3, [#allocation3], %s193_s27, %s193_s27, %s194_s28  }
 0x229   :  { %188 = dma.done.wait [#allocation3], 256  }
 0x22a   :  { %189 = vsyncadd [#allocation3], 4294967040 }
 0x22b   :  { %133 = vsyncpa [#allocation3], 1 }

</bundles_post_ra>
